<compile_context>
chip_gen: v7x
topology: tpu7x:2x2x1
jax: 0.10.0
libtpu: 0.0.40
codegen_flags: <defaults>
</compile_context>

<pallas_src>
import numpy as np
import jax
import jax.numpy as jnp
from jax.experimental import pallas as pl
from jax.experimental.pallas import tpu as pltpu


# --------------------------- Pallas conv2d (stride 1) ------------------------ #

def _conv_gemm_kernel(B, Cin, Cout, K, Wp, Ho, Lo):
    """im2col via contiguous tap slices + a single GEMM per batch element."""
    KKC = K * K * Cin

    def kernel(x_ref, w_ref, o_ref, p_ref):
        # x_ref: (B, Cin, Lp)   zero-padded input, spatially flattened (bf16)
        # w_ref: (Cout, KKC)    packed weight (bf16)
        # o_ref: (B, Cout, Lo)  flat output slab, Lo = Ho*Wp (f32)
        # p_ref: (KKC, Lo)      VMEM scratch: im2col patch matrix
        w = w_ref[...]                              # load weight once
        for b in range(B):                          # small & static
            for ky in range(K):
                for kx in range(K):
                    t = ky * K + kx
                    q0 = ky * Wp + kx               # static flat offset of this tap
                    p_ref[t * Cin:(t + 1) * Cin, :] = x_ref[b, :, q0:q0 + Lo]
            o_ref[b] = jnp.dot(w, p_ref[...],
                               preferred_element_type=jnp.float32
                               ).astype(o_ref.dtype)

    return kernel


def pack_weight(w_oihw, compute_dtype=jnp.bfloat16):
    """(Cout, Cin, K, K) -> (Cout, K*K*Cin); column order (ky, kx, ci)."""
    Cout, Cin, K, K2 = w_oihw.shape
    assert K == K2
    return jnp.transpose(w_oihw, (0, 2, 3, 1)).reshape(
        Cout, K * K * Cin).astype(compute_dtype)


def conv2d_pallas(x_nchw, w_packed, *, kernel_size, padding,
                  compute_dtype=jnp.bfloat16):
    """Stride-1 zero-padded 2-D cross-correlation (== F.conv2d with stride=1).

    `w_packed` is the (Cout, K*K*Cin) weight produced by `pack_weight`.
    """
    B, Cin, H, W = x_nchw.shape
    K = int(kernel_size)
    Cout, KKC = w_packed.shape
    assert KKC == K * K * Cin, "packed weight does not match input channels"
    p = int(padding)
    Hp, Wp = H + 2 * p, W + 2 * p
    Ho, Wo = Hp - K + 1, Wp - K + 1
    extra_rows = 0 if K == 1 else 1      # tail zeros so every tap slice stays in range
    Lp = (Hp + extra_rows) * Wp
    Lo = Ho * Wp                         # flat output length (cols >= Wo are junk)

    # Only wrapper pass: a fused cast + zero-pad of a KB-sized tensor.  The
    # spatial flatten here and the un-flatten of the output are free row-major
    # reshapes — no NCHW<->NHWC transposes anywhere.
    xf = jnp.pad(x_nchw.astype(compute_dtype),
                 ((0, 0), (0, 0), (p, p + extra_rows), (p, p))
                 ).reshape(B, Cin, Lp)

    out_flat = pl.pallas_call(
        _conv_gemm_kernel(B, Cin, Cout, K, Wp, Ho, Lo),
        out_shape=jax.ShapeDtypeStruct((B, Cout, Lo), jnp.float32),
        grid=(1,),
        in_specs=[
            pl.BlockSpec((B, Cin, Lp), lambda i: (0, 0, 0)),
            pl.BlockSpec((Cout, KKC), lambda i: (0, 0)),
        ],
        out_specs=pl.BlockSpec((B, Cout, Lo), lambda i: (0, 0, 0)),
        scratch_shapes=[pltpu.VMEM((KKC, Lo), compute_dtype)],
        compiler_params=pltpu.CompilerParams(
            dimension_semantics=("arbitrary",)),
    )(xf, w_packed)

    return out_flat.reshape(B, Cout, Ho, Wp)[:, :, :, :Wo]


# XLA reference conv (identical bf16-in / f32-accumulate numerics) for checking.
def conv2d_ref(x_nchw, w_oihw, padding, compute_dtype=jnp.bfloat16):
    p = int(padding)
    return jax.lax.conv_general_dilated(
        x_nchw.astype(compute_dtype), w_oihw.astype(compute_dtype),
        window_strides=(1, 1), padding=[(p, p), (p, p)],
        dimension_numbers=("NCHW", "OIHW", "NCHW"),
        preferred_element_type=jnp.float32)


# ------------------------------ JAX glue ops -------------------------------- #

def avg_pool2(x):                  # F.avg_pool2d(x, 2), NCHW
    B, C, H, W = x.shape
    return x.reshape(B, C, H // 2, 2, W // 2, 2).mean(axis=(3, 5))


def upsample_nearest2(x):          # F.interpolate(scale_factor=2, mode='nearest')
    return jnp.repeat(jnp.repeat(x, 2, axis=2), 2, axis=3)


# -------------------------------- OctConv ----------------------------------- #

class OctConvPallas:
    def __init__(self, ch_in, ch_out, kernel_size, stride=1, alphas=(0.5, 0.5),
                 *, key, compute_dtype=jnp.bfloat16):
        if stride != 1:
            # TODO(synk): the Pallas conv is stride-1 only; stride != 1 (which in the
            # reference only changes the padding formula) is not implemented.
            raise NotImplementedError("OctConvPallas supports stride=1 only")
        self.alpha_in, self.alpha_out = alphas
        assert 0 <= self.alpha_in <= 1 and 0 <= self.alpha_out <= 1
        self.ch_in_hf = int((1 - self.alpha_in) * ch_in)
        self.ch_in_lf = ch_in - self.ch_in_hf
        self.ch_out_hf = int((1 - self.alpha_out) * ch_out)
        self.ch_out_lf = ch_out - self.ch_out_hf
        self.kernel_size = kernel_size
        self.padding = (kernel_size - stride) // 2
        self.compute_dtype = compute_dtype

        k0, k1, k2, k3 = jax.random.split(key, 4)
        ks = kernel_size
        # deterministic stand-ins for torch.randn parameters (f32/OIHW for the reference)
        self.wHtoH = jax.random.normal(k0, (self.ch_out_hf, self.ch_in_hf, ks, ks), jnp.float32)
        self.wHtoL = jax.random.normal(k1, (self.ch_out_lf, self.ch_in_hf, ks, ks), jnp.float32)
        self.wLtoH = jax.random.normal(k2, (self.ch_out_hf, self.ch_in_lf, ks, ks), jnp.float32)
        self.wLtoL = jax.random.normal(k3, (self.ch_out_lf, self.ch_in_lf, ks, ks), jnp.float32)

        # Pre-packed 2-D bf16 weights (done once).  LtoH/LtoL share lf_input, so
        # their weights are fused along Cout into a single kernel launch.
        self.wHtoH_p = pack_weight(self.wHtoH, compute_dtype)
        self.wHtoL_p = pack_weight(self.wHtoL, compute_dtype)
        self.wL_p = pack_weight(
            jnp.concatenate([self.wLtoH, self.wLtoL], axis=0), compute_dtype)

    # ---- Pallas forward ---- #
    def __call__(self, x):
        # TODO(synk): only the default 0 < alpha_in, alpha_out < 1 path (packed
        # hf+lf octave input) is implemented; degenerate alpha={0,1} branches omitted.
        assert 0.0 < self.alpha_in < 1.0 and 0.0 < self.alpha_out < 1.0
        fmap = x.shape[-1]
        hf_input = x[:, :self.ch_in_hf * 4, :, :].reshape(
            -1, self.ch_in_hf, fmap * 2, fmap * 2)
        lf_input = x[:, self.ch_in_hf * 4:, :, :]

        conv = lambda inp, wp: conv2d_pallas(
            inp, wp, kernel_size=self.kernel_size, padding=self.padding,
            compute_dtype=self.compute_dtype)

        HtoH = conv(hf_input, self.wHtoH_p)
        HtoL = conv(avg_pool2(hf_input), self.wHtoL_p)
        L = conv(lf_input, self.wL_p)                   # fused LtoH | LtoL
        LtoH = upsample_nearest2(L[:, :self.ch_out_hf])
        LtoL = L[:, self.ch_out_hf:]

        hf_output = HtoH + LtoH
        lf_output = LtoL + HtoL
        fm = hf_output.shape[-1] // 2
        hf_output = hf_output.reshape(-1, 4 * self.ch_out_hf, fm, fm)
        return jnp.concatenate([hf_output, lf_output], axis=1)

    # ---- XLA reference path (mirrors the PyTorch forward, same bf16 numerics) ---- #
    def reference(self, x):
        assert 0.0 < self.alpha_in < 1.0 and 0.0 < self.alpha_out < 1.0
        fmap = x.shape[-1]
        hf_input = x[:, :self.ch_in_hf * 4, :, :].reshape(
            -1, self.ch_in_hf, fmap * 2, fmap * 2)
        lf_input = x[:, self.ch_in_hf * 4:, :, :]

        HtoH = conv2d_ref(hf_input, self.wHtoH, self.padding, self.compute_dtype)
        HtoL = conv2d_ref(avg_pool2(hf_input), self.wHtoL, self.padding, self.compute_dtype)
        LtoH = upsample_nearest2(
            conv2d_ref(lf_input, self.wLtoH, self.padding, self.compute_dtype))
        LtoL = conv2d_ref(lf_input, self.wLtoL, self.padding, self.compute_dtype)

        hf_output = HtoH + LtoH
        lf_output = LtoL + HtoL
        fm = hf_output.shape[-1] // 2
        hf_output = hf_output.reshape(-1, 4 * self.ch_out_hf, fm, fm)
        return jnp.concatenate([hf_output, lf_output], axis=1)


# --------------------------------- main -------------------------------------- #

if __name__ == "__main__":
    key = jax.random.PRNGKey(0)
    k_x, k_w = jax.random.split(key)

    ch_in, ch_out, kernel_size = 4, 4, 3
    B, fmap = 2, 8                                    # low-frequency spatial size
    mod = OctConvPallas(ch_in, ch_out, kernel_size, key=k_w)

    packed_in_ch = mod.ch_in_hf * 4 + mod.ch_in_lf    # octave-packed NCHW input
    x = jax.random.normal(k_x, (B, packed_in_ch, fmap, fmap), jnp.float32)

    out = jax.block_until_ready(jax.jit(mod.__call__)(x))
    ref = jax.block_until_ready(jax.jit(mod.reference)(x))

    np.testing.assert_allclose(np.asarray(out), np.asarray(ref), rtol=1e-2, atol=1e-2)
    print("KERNEL_OK")
</pallas_src>

<mosaic_0001>
module attributes {stable_mosaic.version = 11 : i64} {
  func.func @kernel(%arg0: i32, %arg1: memref<2x2x110xbf16, #tpu.memory_space<vmem>>, %arg2: memref<2x18xbf16, #tpu.memory_space<vmem>>, %arg3: memref<2x2x80xf32, #tpu.memory_space<vmem>>, %arg4: memref<18x80xbf16, #tpu.memory_space<vmem>>) attributes {dimension_semantics = [#tpu.dimension_semantics<arbitrary>], iteration_bounds = array<i64: 1>, scalar_prefetch = 0 : i64, scratch_operands = 1 : i64, tpu.core_type = #tpu.core_type<tc>, window_params = [{pipeline_mode = #tpu.pipeline_mode<synchronous>, transform_indices = @transform_0, window_bounds = array<i64: 2, 2, 110>}, {pipeline_mode = #tpu.pipeline_mode<synchronous>, transform_indices = @transform_1, window_bounds = array<i64: 2, 18>}, {pipeline_mode = #tpu.pipeline_mode<synchronous>, transform_indices = @transform_2, window_bounds = array<i64: 2, 2, 80>}]} {
    %c0 = arith.constant 0 : index
    %c0_0 = arith.constant 0 : index
    %0 = vector.load %arg2[%c0, %c0_0] : memref<2x18xbf16, #tpu.memory_space<vmem>>, vector<2x18xbf16>
    %c0_1 = arith.constant 0 : index
    %c0_2 = arith.constant 0 : index
    %c0_3 = arith.constant 0 : index
    %1 = vector.load %arg1[%c0_1, %c0_2, %c0_3] : memref<2x2x110xbf16, #tpu.memory_space<vmem>>, vector<1x2x80xbf16>
    %2 = vector.shape_cast %1 : vector<1x2x80xbf16> to vector<2x80xbf16>
    %c0_4 = arith.constant 0 : index
    %c0_5 = arith.constant 0 : index
    %3 = vector.load %arg4[%c0_4, %c0_5] : memref<18x80xbf16, #tpu.memory_space<vmem>>, vector<2x80xbf16>
    tpu.vector_store %arg4[%c0_4, %c0_5], %2 {strides = array<i32>} : memref<18x80xbf16, #tpu.memory_space<vmem>>, vector<2x80xbf16>,
    %c0_6 = arith.constant 0 : index
    %c0_7 = arith.constant 0 : index
    %c1 = arith.constant 1 : index
    %4 = vector.load %arg1[%c0_6, %c0_7, %c1] : memref<2x2x110xbf16, #tpu.memory_space<vmem>>, vector<1x2x80xbf16>
    %5 = vector.shape_cast %4 : vector<1x2x80xbf16> to vector<2x80xbf16>
    %c2 = arith.constant 2 : index
    %c0_8 = arith.constant 0 : index
    %6 = vector.load %arg4[%c2, %c0_8] : memref<18x80xbf16, #tpu.memory_space<vmem>>, vector<2x80xbf16>
    tpu.vector_store %arg4[%c2, %c0_8], %5 {strides = array<i32>} : memref<18x80xbf16, #tpu.memory_space<vmem>>, vector<2x80xbf16>,
    %c0_9 = arith.constant 0 : index
    %c0_10 = arith.constant 0 : index
    %c2_11 = arith.constant 2 : index
    %7 = vector.load %arg1[%c0_9, %c0_10, %c2_11] : memref<2x2x110xbf16, #tpu.memory_space<vmem>>, vector<1x2x80xbf16>
    %8 = vector.shape_cast %7 : vector<1x2x80xbf16> to vector<2x80xbf16>
    %c4 = arith.constant 4 : index
    %c0_12 = arith.constant 0 : index
    %9 = vector.load %arg4[%c4, %c0_12] : memref<18x80xbf16, #tpu.memory_space<vmem>>, vector<2x80xbf16>
    tpu.vector_store %arg4[%c4, %c0_12], %8 {strides = array<i32>} : memref<18x80xbf16, #tpu.memory_space<vmem>>, vector<2x80xbf16>,
    %c0_13 = arith.constant 0 : index
    %c0_14 = arith.constant 0 : index
    %c10 = arith.constant 10 : index
    %10 = vector.load %arg1[%c0_13, %c0_14, %c10] : memref<2x2x110xbf16, #tpu.memory_space<vmem>>, vector<1x2x80xbf16>
    %11 = vector.shape_cast %10 : vector<1x2x80xbf16> to vector<2x80xbf16>
    %c6 = arith.constant 6 : index
    %c0_15 = arith.constant 0 : index
    %12 = vector.load %arg4[%c6, %c0_15] : memref<18x80xbf16, #tpu.memory_space<vmem>>, vector<2x80xbf16>
    tpu.vector_store %arg4[%c6, %c0_15], %11 {strides = array<i32>} : memref<18x80xbf16, #tpu.memory_space<vmem>>, vector<2x80xbf16>,
    %c0_16 = arith.constant 0 : index
    %c0_17 = arith.constant 0 : index
    %c11 = arith.constant 11 : index
    %13 = vector.load %arg1[%c0_16, %c0_17, %c11] : memref<2x2x110xbf16, #tpu.memory_space<vmem>>, vector<1x2x80xbf16>
    %14 = vector.shape_cast %13 : vector<1x2x80xbf16> to vector<2x80xbf16>
    %c8 = arith.constant 8 : index
    %c0_18 = arith.constant 0 : index
    %15 = vector.load %arg4[%c8, %c0_18] : memref<18x80xbf16, #tpu.memory_space<vmem>>, vector<2x80xbf16>
    tpu.vector_store %arg4[%c8, %c0_18], %14 {strides = array<i32>} : memref<18x80xbf16, #tpu.memory_space<vmem>>, vector<2x80xbf16>,
    %c0_19 = arith.constant 0 : index
    %c0_20 = arith.constant 0 : index
    %c12 = arith.constant 12 : index
    %16 = vector.load %arg1[%c0_19, %c0_20, %c12] : memref<2x2x110xbf16, #tpu.memory_space<vmem>>, vector<1x2x80xbf16>
    %17 = vector.shape_cast %16 : vector<1x2x80xbf16> to vector<2x80xbf16>
    %c10_21 = arith.constant 10 : index
    %c0_22 = arith.constant 0 : index
    %18 = vector.load %arg4[%c10_21, %c0_22] : memref<18x80xbf16, #tpu.memory_space<vmem>>, vector<2x80xbf16>
    tpu.vector_store %arg4[%c10_21, %c0_22], %17 {strides = array<i32>} : memref<18x80xbf16, #tpu.memory_space<vmem>>, vector<2x80xbf16>,
    %c0_23 = arith.constant 0 : index
    %c0_24 = arith.constant 0 : index
    %c20 = arith.constant 20 : index
    %19 = vector.load %arg1[%c0_23, %c0_24, %c20] : memref<2x2x110xbf16, #tpu.memory_space<vmem>>, vector<1x2x80xbf16>
    %20 = vector.shape_cast %19 : vector<1x2x80xbf16> to vector<2x80xbf16>
    %c12_25 = arith.constant 12 : index
    %c0_26 = arith.constant 0 : index
    %21 = vector.load %arg4[%c12_25, %c0_26] : memref<18x80xbf16, #tpu.memory_space<vmem>>, vector<2x80xbf16>
    tpu.vector_store %arg4[%c12_25, %c0_26], %20 {strides = array<i32>} : memref<18x80xbf16, #tpu.memory_space<vmem>>, vector<2x80xbf16>,
    %c0_27 = arith.constant 0 : index
    %c0_28 = arith.constant 0 : index
    %c21 = arith.constant 21 : index
    %22 = vector.load %arg1[%c0_27, %c0_28, %c21] : memref<2x2x110xbf16, #tpu.memory_space<vmem>>, vector<1x2x80xbf16>
    %23 = vector.shape_cast %22 : vector<1x2x80xbf16> to vector<2x80xbf16>
    %c14 = arith.constant 14 : index
    %c0_29 = arith.constant 0 : index
    %24 = vector.load %arg4[%c14, %c0_29] : memref<18x80xbf16, #tpu.memory_space<vmem>>, vector<2x80xbf16>
    tpu.vector_store %arg4[%c14, %c0_29], %23 {strides = array<i32>} : memref<18x80xbf16, #tpu.memory_space<vmem>>, vector<2x80xbf16>,
    %c0_30 = arith.constant 0 : index
    %c0_31 = arith.constant 0 : index
    %c22 = arith.constant 22 : index
    %25 = vector.load %arg1[%c0_30, %c0_31, %c22] : memref<2x2x110xbf16, #tpu.memory_space<vmem>>, vector<1x2x80xbf16>
    %26 = vector.shape_cast %25 : vector<1x2x80xbf16> to vector<2x80xbf16>
    %c16 = arith.constant 16 : index
    %c0_32 = arith.constant 0 : index
    %27 = vector.load %arg4[%c16, %c0_32] : memref<18x80xbf16, #tpu.memory_space<vmem>>, vector<2x80xbf16>
    tpu.vector_store %arg4[%c16, %c0_32], %26 {strides = array<i32>} : memref<18x80xbf16, #tpu.memory_space<vmem>>, vector<2x80xbf16>,
    %c0_33 = arith.constant 0 : index
    %c0_34 = arith.constant 0 : index
    %28 = vector.load %arg4[%c0_33, %c0_34] : memref<18x80xbf16, #tpu.memory_space<vmem>>, vector<18x80xbf16>
    %cst = arith.constant dense<0.000000e+00> : vector<2x80xf32>
    %29 = tpu.matmul %0, %28, %cst {dimension_numbers = #tpu.dot_dimension_numbers<[1], [0], [0], [1], [0, 0, 1, 1], [], []>} : vector<2x18xbf16>, vector<18x80xbf16>, vector<2x80xf32> -> vector<2x80xf32>
    %c0_35 = arith.constant 0 : index
    %c0_36 = arith.constant 0 : index
    %c0_37 = arith.constant 0 : index
    %30 = vector.load %arg3[%c0_35, %c0_36, %c0_37] : memref<2x2x80xf32, #tpu.memory_space<vmem>>, vector<1x2x80xf32>
    %31 = vector.shape_cast %30 : vector<1x2x80xf32> to vector<2x80xf32>
    %32 = vector.shape_cast %29 : vector<2x80xf32> to vector<1x2x80xf32>
    tpu.vector_store %arg3[%c0_35, %c0_36, %c0_37], %32 {strides = array<i32>} : memref<2x2x80xf32, #tpu.memory_space<vmem>>, vector<1x2x80xf32>,
    %c1_38 = arith.constant 1 : index
    %c0_39 = arith.constant 0 : index
    %c0_40 = arith.constant 0 : index
    %33 = vector.load %arg1[%c1_38, %c0_39, %c0_40] : memref<2x2x110xbf16, #tpu.memory_space<vmem>>, vector<1x2x80xbf16>
    %34 = vector.shape_cast %33 : vector<1x2x80xbf16> to vector<2x80xbf16>
    %c0_41 = arith.constant 0 : index
    %c0_42 = arith.constant 0 : index
    %35 = vector.load %arg4[%c0_41, %c0_42] : memref<18x80xbf16, #tpu.memory_space<vmem>>, vector<2x80xbf16>
    tpu.vector_store %arg4[%c0_41, %c0_42], %34 {strides = array<i32>} : memref<18x80xbf16, #tpu.memory_space<vmem>>, vector<2x80xbf16>,
    %c1_43 = arith.constant 1 : index
    %c0_44 = arith.constant 0 : index
    %c1_45 = arith.constant 1 : index
    %36 = vector.load %arg1[%c1_43, %c0_44, %c1_45] : memref<2x2x110xbf16, #tpu.memory_space<vmem>>, vector<1x2x80xbf16>
    %37 = vector.shape_cast %36 : vector<1x2x80xbf16> to vector<2x80xbf16>
    %c2_46 = arith.constant 2 : index
    %c0_47 = arith.constant 0 : index
    %38 = vector.load %arg4[%c2_46, %c0_47] : memref<18x80xbf16, #tpu.memory_space<vmem>>, vector<2x80xbf16>
    tpu.vector_store %arg4[%c2_46, %c0_47], %37 {strides = array<i32>} : memref<18x80xbf16, #tpu.memory_space<vmem>>, vector<2x80xbf16>,
    %c1_48 = arith.constant 1 : index
    %c0_49 = arith.constant 0 : index
    %c2_50 = arith.constant 2 : index
    %39 = vector.load %arg1[%c1_48, %c0_49, %c2_50] : memref<2x2x110xbf16, #tpu.memory_space<vmem>>, vector<1x2x80xbf16>
    %40 = vector.shape_cast %39 : vector<1x2x80xbf16> to vector<2x80xbf16>
    %c4_51 = arith.constant 4 : index
    %c0_52 = arith.constant 0 : index
    %41 = vector.load %arg4[%c4_51, %c0_52] : memref<18x80xbf16, #tpu.memory_space<vmem>>, vector<2x80xbf16>
    tpu.vector_store %arg4[%c4_51, %c0_52], %40 {strides = array<i32>} : memref<18x80xbf16, #tpu.memory_space<vmem>>, vector<2x80xbf16>,
    %c1_53 = arith.constant 1 : index
    %c0_54 = arith.constant 0 : index
    %c10_55 = arith.constant 10 : index
    %42 = vector.load %arg1[%c1_53, %c0_54, %c10_55] : memref<2x2x110xbf16, #tpu.memory_space<vmem>>, vector<1x2x80xbf16>
    %43 = vector.shape_cast %42 : vector<1x2x80xbf16> to vector<2x80xbf16>
    %c6_56 = arith.constant 6 : index
    %c0_57 = arith.constant 0 : index
    %44 = vector.load %arg4[%c6_56, %c0_57] : memref<18x80xbf16, #tpu.memory_space<vmem>>, vector<2x80xbf16>
    tpu.vector_store %arg4[%c6_56, %c0_57], %43 {strides = array<i32>} : memref<18x80xbf16, #tpu.memory_space<vmem>>, vector<2x80xbf16>,
    %c1_58 = arith.constant 1 : index
    %c0_59 = arith.constant 0 : index
    %c11_60 = arith.constant 11 : index
    %45 = vector.load %arg1[%c1_58, %c0_59, %c11_60] : memref<2x2x110xbf16, #tpu.memory_space<vmem>>, vector<1x2x80xbf16>
    %46 = vector.shape_cast %45 : vector<1x2x80xbf16> to vector<2x80xbf16>
    %c8_61 = arith.constant 8 : index
    %c0_62 = arith.constant 0 : index
    %47 = vector.load %arg4[%c8_61, %c0_62] : memref<18x80xbf16, #tpu.memory_space<vmem>>, vector<2x80xbf16>
    tpu.vector_store %arg4[%c8_61, %c0_62], %46 {strides = array<i32>} : memref<18x80xbf16, #tpu.memory_space<vmem>>, vector<2x80xbf16>,
    %c1_63 = arith.constant 1 : index
    %c0_64 = arith.constant 0 : index
    %c12_65 = arith.constant 12 : index
    %48 = vector.load %arg1[%c1_63, %c0_64, %c12_65] : memref<2x2x110xbf16, #tpu.memory_space<vmem>>, vector<1x2x80xbf16>
    %49 = vector.shape_cast %48 : vector<1x2x80xbf16> to vector<2x80xbf16>
    %c10_66 = arith.constant 10 : index
    %c0_67 = arith.constant 0 : index
    %50 = vector.load %arg4[%c10_66, %c0_67] : memref<18x80xbf16, #tpu.memory_space<vmem>>, vector<2x80xbf16>
    tpu.vector_store %arg4[%c10_66, %c0_67], %49 {strides = array<i32>} : memref<18x80xbf16, #tpu.memory_space<vmem>>, vector<2x80xbf16>,
    %c1_68 = arith.constant 1 : index
    %c0_69 = arith.constant 0 : index
    %c20_70 = arith.constant 20 : index
    %51 = vector.load %arg1[%c1_68, %c0_69, %c20_70] : memref<2x2x110xbf16, #tpu.memory_space<vmem>>, vector<1x2x80xbf16>
    %52 = vector.shape_cast %51 : vector<1x2x80xbf16> to vector<2x80xbf16>
    %c12_71 = arith.constant 12 : index
    %c0_72 = arith.constant 0 : index
    %53 = vector.load %arg4[%c12_71, %c0_72] : memref<18x80xbf16, #tpu.memory_space<vmem>>, vector<2x80xbf16>
    tpu.vector_store %arg4[%c12_71, %c0_72], %52 {strides = array<i32>} : memref<18x80xbf16, #tpu.memory_space<vmem>>, vector<2x80xbf16>,
    %c1_73 = arith.constant 1 : index
    %c0_74 = arith.constant 0 : index
    %c21_75 = arith.constant 21 : index
    %54 = vector.load %arg1[%c1_73, %c0_74, %c21_75] : memref<2x2x110xbf16, #tpu.memory_space<vmem>>, vector<1x2x80xbf16>
    %55 = vector.shape_cast %54 : vector<1x2x80xbf16> to vector<2x80xbf16>
    %c14_76 = arith.constant 14 : index
    %c0_77 = arith.constant 0 : index
    %56 = vector.load %arg4[%c14_76, %c0_77] : memref<18x80xbf16, #tpu.memory_space<vmem>>, vector<2x80xbf16>
    tpu.vector_store %arg4[%c14_76, %c0_77], %55 {strides = array<i32>} : memref<18x80xbf16, #tpu.memory_space<vmem>>, vector<2x80xbf16>,
    %c1_78 = arith.constant 1 : index
    %c0_79 = arith.constant 0 : index
    %c22_80 = arith.constant 22 : index
    %57 = vector.load %arg1[%c1_78, %c0_79, %c22_80] : memref<2x2x110xbf16, #tpu.memory_space<vmem>>, vector<1x2x80xbf16>
    %58 = vector.shape_cast %57 : vector<1x2x80xbf16> to vector<2x80xbf16>
    %c16_81 = arith.constant 16 : index
    %c0_82 = arith.constant 0 : index
    %59 = vector.load %arg4[%c16_81, %c0_82] : memref<18x80xbf16, #tpu.memory_space<vmem>>, vector<2x80xbf16>
    tpu.vector_store %arg4[%c16_81, %c0_82], %58 {strides = array<i32>} : memref<18x80xbf16, #tpu.memory_space<vmem>>, vector<2x80xbf16>,
    %c0_83 = arith.constant 0 : index
    %c0_84 = arith.constant 0 : index
    %60 = vector.load %arg4[%c0_83, %c0_84] : memref<18x80xbf16, #tpu.memory_space<vmem>>, vector<18x80xbf16>
    %cst_85 = arith.constant dense<0.000000e+00> : vector<2x80xf32>
    %61 = tpu.matmul %0, %60, %cst_85 {dimension_numbers = #tpu.dot_dimension_numbers<[1], [0], [0], [1], [0, 0, 1, 1], [], []>} : vector<2x18xbf16>, vector<18x80xbf16>, vector<2x80xf32> -> vector<2x80xf32>
    %c1_86 = arith.constant 1 : index
    %c0_87 = arith.constant 0 : index
    %c0_88 = arith.constant 0 : index
    %62 = vector.load %arg3[%c1_86, %c0_87, %c0_88] : memref<2x2x80xf32, #tpu.memory_space<vmem>>, vector<1x2x80xf32>
    %63 = vector.shape_cast %62 : vector<1x2x80xf32> to vector<2x80xf32>
    %64 = vector.shape_cast %61 : vector<2x80xf32> to vector<1x2x80xf32>
    tpu.vector_store %arg3[%c1_86, %c0_87, %c0_88], %64 {strides = array<i32>} : memref<2x2x80xf32, #tpu.memory_space<vmem>>, vector<1x2x80xf32>,
    return
  }
  func.func @transform_0(%arg0: i32) -> (i32, i32, i32) {
    %c0_i32 = arith.constant 0 : i32
    %c0_i32_0 = arith.constant 0 : i32
    %c0_i32_1 = arith.constant 0 : i32
    %c0_i32_2 = arith.constant 0 : i32
    return %c0_i32, %c0_i32_0, %c0_i32_1 : i32, i32, i32
  }
  func.func @transform_1(%arg0: i32) -> (i32, i32) {
    %c0_i32 = arith.constant 0 : i32
    %c0_i32_0 = arith.constant 0 : i32
    %c0_i32_1 = arith.constant 0 : i32
    return %c0_i32, %c0_i32_0 : i32, i32
  }
  func.func @transform_2(%arg0: i32) -> (i32, i32, i32) {
    %c0_i32 = arith.constant 0 : i32
    %c0_i32_0 = arith.constant 0 : i32
    %c0_i32_1 = arith.constant 0 : i32
    %c0_i32_2 = arith.constant 0 : i32
    return %c0_i32, %c0_i32_0, %c0_i32_1 : i32, i32, i32
  }
}

module attributes {stable_mosaic.version = 11 : i64} {
  func.func @kernel(%arg0: i32, %arg1: memref<2x2x110xbf16, #tpu.memory_space<vmem>>, %arg2: memref<4x18xbf16, #tpu.memory_space<vmem>>, %arg3: memref<2x4x80xf32, #tpu.memory_space<vmem>>, %arg4: memref<18x80xbf16, #tpu.memory_space<vmem>>) attributes {dimension_semantics = [#tpu.dimension_semantics<arbitrary>], iteration_bounds = array<i64: 1>, scalar_prefetch = 0 : i64, scratch_operands = 1 : i64, tpu.core_type = #tpu.core_type<tc>, window_params = [{pipeline_mode = #tpu.pipeline_mode<synchronous>, transform_indices = @transform_0, window_bounds = array<i64: 2, 2, 110>}, {pipeline_mode = #tpu.pipeline_mode<synchronous>, transform_indices = @transform_1, window_bounds = array<i64: 4, 18>}, {pipeline_mode = #tpu.pipeline_mode<synchronous>, transform_indices = @transform_2, window_bounds = array<i64: 2, 4, 80>}]} {
    %c0 = arith.constant 0 : index
    %c0_0 = arith.constant 0 : index
    %0 = vector.load %arg2[%c0, %c0_0] : memref<4x18xbf16, #tpu.memory_space<vmem>>, vector<4x18xbf16>
    %c0_1 = arith.constant 0 : index
    %c0_2 = arith.constant 0 : index
    %c0_3 = arith.constant 0 : index
    %1 = vector.load %arg1[%c0_1, %c0_2, %c0_3] : memref<2x2x110xbf16, #tpu.memory_space<vmem>>, vector<1x2x80xbf16>
    %2 = vector.shape_cast %1 : vector<1x2x80xbf16> to vector<2x80xbf16>
    %c0_4 = arith.constant 0 : index
    %c0_5 = arith.constant 0 : index
    %3 = vector.load %arg4[%c0_4, %c0_5] : memref<18x80xbf16, #tpu.memory_space<vmem>>, vector<2x80xbf16>
    tpu.vector_store %arg4[%c0_4, %c0_5], %2 {strides = array<i32>} : memref<18x80xbf16, #tpu.memory_space<vmem>>, vector<2x80xbf16>,
    %c0_6 = arith.constant 0 : index
    %c0_7 = arith.constant 0 : index
    %c1 = arith.constant 1 : index
    %4 = vector.load %arg1[%c0_6, %c0_7, %c1] : memref<2x2x110xbf16, #tpu.memory_space<vmem>>, vector<1x2x80xbf16>
    %5 = vector.shape_cast %4 : vector<1x2x80xbf16> to vector<2x80xbf16>
    %c2 = arith.constant 2 : index
    %c0_8 = arith.constant 0 : index
    %6 = vector.load %arg4[%c2, %c0_8] : memref<18x80xbf16, #tpu.memory_space<vmem>>, vector<2x80xbf16>
    tpu.vector_store %arg4[%c2, %c0_8], %5 {strides = array<i32>} : memref<18x80xbf16, #tpu.memory_space<vmem>>, vector<2x80xbf16>,
    %c0_9 = arith.constant 0 : index
    %c0_10 = arith.constant 0 : index
    %c2_11 = arith.constant 2 : index
    %7 = vector.load %arg1[%c0_9, %c0_10, %c2_11] : memref<2x2x110xbf16, #tpu.memory_space<vmem>>, vector<1x2x80xbf16>
    %8 = vector.shape_cast %7 : vector<1x2x80xbf16> to vector<2x80xbf16>
    %c4 = arith.constant 4 : index
    %c0_12 = arith.constant 0 : index
    %9 = vector.load %arg4[%c4, %c0_12] : memref<18x80xbf16, #tpu.memory_space<vmem>>, vector<2x80xbf16>
    tpu.vector_store %arg4[%c4, %c0_12], %8 {strides = array<i32>} : memref<18x80xbf16, #tpu.memory_space<vmem>>, vector<2x80xbf16>,
    %c0_13 = arith.constant 0 : index
    %c0_14 = arith.constant 0 : index
    %c10 = arith.constant 10 : index
    %10 = vector.load %arg1[%c0_13, %c0_14, %c10] : memref<2x2x110xbf16, #tpu.memory_space<vmem>>, vector<1x2x80xbf16>
    %11 = vector.shape_cast %10 : vector<1x2x80xbf16> to vector<2x80xbf16>
    %c6 = arith.constant 6 : index
    %c0_15 = arith.constant 0 : index
    %12 = vector.load %arg4[%c6, %c0_15] : memref<18x80xbf16, #tpu.memory_space<vmem>>, vector<2x80xbf16>
    tpu.vector_store %arg4[%c6, %c0_15], %11 {strides = array<i32>} : memref<18x80xbf16, #tpu.memory_space<vmem>>, vector<2x80xbf16>,
    %c0_16 = arith.constant 0 : index
    %c0_17 = arith.constant 0 : index
    %c11 = arith.constant 11 : index
    %13 = vector.load %arg1[%c0_16, %c0_17, %c11] : memref<2x2x110xbf16, #tpu.memory_space<vmem>>, vector<1x2x80xbf16>
    %14 = vector.shape_cast %13 : vector<1x2x80xbf16> to vector<2x80xbf16>
    %c8 = arith.constant 8 : index
    %c0_18 = arith.constant 0 : index
    %15 = vector.load %arg4[%c8, %c0_18] : memref<18x80xbf16, #tpu.memory_space<vmem>>, vector<2x80xbf16>
    tpu.vector_store %arg4[%c8, %c0_18], %14 {strides = array<i32>} : memref<18x80xbf16, #tpu.memory_space<vmem>>, vector<2x80xbf16>,
    %c0_19 = arith.constant 0 : index
    %c0_20 = arith.constant 0 : index
    %c12 = arith.constant 12 : index
    %16 = vector.load %arg1[%c0_19, %c0_20, %c12] : memref<2x2x110xbf16, #tpu.memory_space<vmem>>, vector<1x2x80xbf16>
    %17 = vector.shape_cast %16 : vector<1x2x80xbf16> to vector<2x80xbf16>
    %c10_21 = arith.constant 10 : index
    %c0_22 = arith.constant 0 : index
    %18 = vector.load %arg4[%c10_21, %c0_22] : memref<18x80xbf16, #tpu.memory_space<vmem>>, vector<2x80xbf16>
    tpu.vector_store %arg4[%c10_21, %c0_22], %17 {strides = array<i32>} : memref<18x80xbf16, #tpu.memory_space<vmem>>, vector<2x80xbf16>,
    %c0_23 = arith.constant 0 : index
    %c0_24 = arith.constant 0 : index
    %c20 = arith.constant 20 : index
    %19 = vector.load %arg1[%c0_23, %c0_24, %c20] : memref<2x2x110xbf16, #tpu.memory_space<vmem>>, vector<1x2x80xbf16>
    %20 = vector.shape_cast %19 : vector<1x2x80xbf16> to vector<2x80xbf16>
    %c12_25 = arith.constant 12 : index
    %c0_26 = arith.constant 0 : index
    %21 = vector.load %arg4[%c12_25, %c0_26] : memref<18x80xbf16, #tpu.memory_space<vmem>>, vector<2x80xbf16>
    tpu.vector_store %arg4[%c12_25, %c0_26], %20 {strides = array<i32>} : memref<18x80xbf16, #tpu.memory_space<vmem>>, vector<2x80xbf16>,
    %c0_27 = arith.constant 0 : index
    %c0_28 = arith.constant 0 : index
    %c21 = arith.constant 21 : index
    %22 = vector.load %arg1[%c0_27, %c0_28, %c21] : memref<2x2x110xbf16, #tpu.memory_space<vmem>>, vector<1x2x80xbf16>
    %23 = vector.shape_cast %22 : vector<1x2x80xbf16> to vector<2x80xbf16>
    %c14 = arith.constant 14 : index
    %c0_29 = arith.constant 0 : index
    %24 = vector.load %arg4[%c14, %c0_29] : memref<18x80xbf16, #tpu.memory_space<vmem>>, vector<2x80xbf16>
    tpu.vector_store %arg4[%c14, %c0_29], %23 {strides = array<i32>} : memref<18x80xbf16, #tpu.memory_space<vmem>>, vector<2x80xbf16>,
    %c0_30 = arith.constant 0 : index
    %c0_31 = arith.constant 0 : index
    %c22 = arith.constant 22 : index
    %25 = vector.load %arg1[%c0_30, %c0_31, %c22] : memref<2x2x110xbf16, #tpu.memory_space<vmem>>, vector<1x2x80xbf16>
    %26 = vector.shape_cast %25 : vector<1x2x80xbf16> to vector<2x80xbf16>
    %c16 = arith.constant 16 : index
    %c0_32 = arith.constant 0 : index
    %27 = vector.load %arg4[%c16, %c0_32] : memref<18x80xbf16, #tpu.memory_space<vmem>>, vector<2x80xbf16>
    tpu.vector_store %arg4[%c16, %c0_32], %26 {strides = array<i32>} : memref<18x80xbf16, #tpu.memory_space<vmem>>, vector<2x80xbf16>,
    %c0_33 = arith.constant 0 : index
    %c0_34 = arith.constant 0 : index
    %28 = vector.load %arg4[%c0_33, %c0_34] : memref<18x80xbf16, #tpu.memory_space<vmem>>, vector<18x80xbf16>
    %cst = arith.constant dense<0.000000e+00> : vector<4x80xf32>
    %29 = tpu.matmul %0, %28, %cst {dimension_numbers = #tpu.dot_dimension_numbers<[1], [0], [0], [1], [0, 0, 1, 1], [], []>} : vector<4x18xbf16>, vector<18x80xbf16>, vector<4x80xf32> -> vector<4x80xf32>
    %c0_35 = arith.constant 0 : index
    %c0_36 = arith.constant 0 : index
    %c0_37 = arith.constant 0 : index
    %30 = vector.load %arg3[%c0_35, %c0_36, %c0_37] : memref<2x4x80xf32, #tpu.memory_space<vmem>>, vector<1x4x80xf32>
    %31 = vector.shape_cast %30 : vector<1x4x80xf32> to vector<4x80xf32>
    %32 = vector.shape_cast %29 : vector<4x80xf32> to vector<1x4x80xf32>
    tpu.vector_store %arg3[%c0_35, %c0_36, %c0_37], %32 {strides = array<i32>} : memref<2x4x80xf32, #tpu.memory_space<vmem>>, vector<1x4x80xf32>,
    %c1_38 = arith.constant 1 : index
    %c0_39 = arith.constant 0 : index
    %c0_40 = arith.constant 0 : index
    %33 = vector.load %arg1[%c1_38, %c0_39, %c0_40] : memref<2x2x110xbf16, #tpu.memory_space<vmem>>, vector<1x2x80xbf16>
    %34 = vector.shape_cast %33 : vector<1x2x80xbf16> to vector<2x80xbf16>
    %c0_41 = arith.constant 0 : index
    %c0_42 = arith.constant 0 : index
    %35 = vector.load %arg4[%c0_41, %c0_42] : memref<18x80xbf16, #tpu.memory_space<vmem>>, vector<2x80xbf16>
    tpu.vector_store %arg4[%c0_41, %c0_42], %34 {strides = array<i32>} : memref<18x80xbf16, #tpu.memory_space<vmem>>, vector<2x80xbf16>,
    %c1_43 = arith.constant 1 : index
    %c0_44 = arith.constant 0 : index
    %c1_45 = arith.constant 1 : index
    %36 = vector.load %arg1[%c1_43, %c0_44, %c1_45] : memref<2x2x110xbf16, #tpu.memory_space<vmem>>, vector<1x2x80xbf16>
    %37 = vector.shape_cast %36 : vector<1x2x80xbf16> to vector<2x80xbf16>
    %c2_46 = arith.constant 2 : index
    %c0_47 = arith.constant 0 : index
    %38 = vector.load %arg4[%c2_46, %c0_47] : memref<18x80xbf16, #tpu.memory_space<vmem>>, vector<2x80xbf16>
    tpu.vector_store %arg4[%c2_46, %c0_47], %37 {strides = array<i32>} : memref<18x80xbf16, #tpu.memory_space<vmem>>, vector<2x80xbf16>,
    %c1_48 = arith.constant 1 : index
    %c0_49 = arith.constant 0 : index
    %c2_50 = arith.constant 2 : index
    %39 = vector.load %arg1[%c1_48, %c0_49, %c2_50] : memref<2x2x110xbf16, #tpu.memory_space<vmem>>, vector<1x2x80xbf16>
    %40 = vector.shape_cast %39 : vector<1x2x80xbf16> to vector<2x80xbf16>
    %c4_51 = arith.constant 4 : index
    %c0_52 = arith.constant 0 : index
    %41 = vector.load %arg4[%c4_51, %c0_52] : memref<18x80xbf16, #tpu.memory_space<vmem>>, vector<2x80xbf16>
    tpu.vector_store %arg4[%c4_51, %c0_52], %40 {strides = array<i32>} : memref<18x80xbf16, #tpu.memory_space<vmem>>, vector<2x80xbf16>,
    %c1_53 = arith.constant 1 : index
    %c0_54 = arith.constant 0 : index
    %c10_55 = arith.constant 10 : index
    %42 = vector.load %arg1[%c1_53, %c0_54, %c10_55] : memref<2x2x110xbf16, #tpu.memory_space<vmem>>, vector<1x2x80xbf16>
    %43 = vector.shape_cast %42 : vector<1x2x80xbf16> to vector<2x80xbf16>
    %c6_56 = arith.constant 6 : index
    %c0_57 = arith.constant 0 : index
    %44 = vector.load %arg4[%c6_56, %c0_57] : memref<18x80xbf16, #tpu.memory_space<vmem>>, vector<2x80xbf16>
    tpu.vector_store %arg4[%c6_56, %c0_57], %43 {strides = array<i32>} : memref<18x80xbf16, #tpu.memory_space<vmem>>, vector<2x80xbf16>,
    %c1_58 = arith.constant 1 : index
    %c0_59 = arith.constant 0 : index
    %c11_60 = arith.constant 11 : index
    %45 = vector.load %arg1[%c1_58, %c0_59, %c11_60] : memref<2x2x110xbf16, #tpu.memory_space<vmem>>, vector<1x2x80xbf16>
    %46 = vector.shape_cast %45 : vector<1x2x80xbf16> to vector<2x80xbf16>
    %c8_61 = arith.constant 8 : index
    %c0_62 = arith.constant 0 : index
    %47 = vector.load %arg4[%c8_61, %c0_62] : memref<18x80xbf16, #tpu.memory_space<vmem>>, vector<2x80xbf16>
    tpu.vector_store %arg4[%c8_61, %c0_62], %46 {strides = array<i32>} : memref<18x80xbf16, #tpu.memory_space<vmem>>, vector<2x80xbf16>,
    %c1_63 = arith.constant 1 : index
    %c0_64 = arith.constant 0 : index
    %c12_65 = arith.constant 12 : index
    %48 = vector.load %arg1[%c1_63, %c0_64, %c12_65] : memref<2x2x110xbf16, #tpu.memory_space<vmem>>, vector<1x2x80xbf16>
    %49 = vector.shape_cast %48 : vector<1x2x80xbf16> to vector<2x80xbf16>
    %c10_66 = arith.constant 10 : index
    %c0_67 = arith.constant 0 : index
    %50 = vector.load %arg4[%c10_66, %c0_67] : memref<18x80xbf16, #tpu.memory_space<vmem>>, vector<2x80xbf16>
    tpu.vector_store %arg4[%c10_66, %c0_67], %49 {strides = array<i32>} : memref<18x80xbf16, #tpu.memory_space<vmem>>, vector<2x80xbf16>,
    %c1_68 = arith.constant 1 : index
    %c0_69 = arith.constant 0 : index
    %c20_70 = arith.constant 20 : index
    %51 = vector.load %arg1[%c1_68, %c0_69, %c20_70] : memref<2x2x110xbf16, #tpu.memory_space<vmem>>, vector<1x2x80xbf16>
    %52 = vector.shape_cast %51 : vector<1x2x80xbf16> to vector<2x80xbf16>
    %c12_71 = arith.constant 12 : index
    %c0_72 = arith.constant 0 : index
    %53 = vector.load %arg4[%c12_71, %c0_72] : memref<18x80xbf16, #tpu.memory_space<vmem>>, vector<2x80xbf16>
    tpu.vector_store %arg4[%c12_71, %c0_72], %52 {strides = array<i32>} : memref<18x80xbf16, #tpu.memory_space<vmem>>, vector<2x80xbf16>,
    %c1_73 = arith.constant 1 : index
    %c0_74 = arith.constant 0 : index
    %c21_75 = arith.constant 21 : index
    %54 = vector.load %arg1[%c1_73, %c0_74, %c21_75] : memref<2x2x110xbf16, #tpu.memory_space<vmem>>, vector<1x2x80xbf16>
    %55 = vector.shape_cast %54 : vector<1x2x80xbf16> to vector<2x80xbf16>
    %c14_76 = arith.constant 14 : index
    %c0_77 = arith.constant 0 : index
    %56 = vector.load %arg4[%c14_76, %c0_77] : memref<18x80xbf16, #tpu.memory_space<vmem>>, vector<2x80xbf16>
    tpu.vector_store %arg4[%c14_76, %c0_77], %55 {strides = array<i32>} : memref<18x80xbf16, #tpu.memory_space<vmem>>, vector<2x80xbf16>,
    %c1_78 = arith.constant 1 : index
    %c0_79 = arith.constant 0 : index
    %c22_80 = arith.constant 22 : index
    %57 = vector.load %arg1[%c1_78, %c0_79, %c22_80] : memref<2x2x110xbf16, #tpu.memory_space<vmem>>, vector<1x2x80xbf16>
    %58 = vector.shape_cast %57 : vector<1x2x80xbf16> to vector<2x80xbf16>
    %c16_81 = arith.constant 16 : index
    %c0_82 = arith.constant 0 : index
    %59 = vector.load %arg4[%c16_81, %c0_82] : memref<18x80xbf16, #tpu.memory_space<vmem>>, vector<2x80xbf16>
    tpu.vector_store %arg4[%c16_81, %c0_82], %58 {strides = array<i32>} : memref<18x80xbf16, #tpu.memory_space<vmem>>, vector<2x80xbf16>,
    %c0_83 = arith.constant 0 : index
    %c0_84 = arith.constant 0 : index
    %60 = vector.load %arg4[%c0_83, %c0_84] : memref<18x80xbf16, #tpu.memory_space<vmem>>, vector<18x80xbf16>
    %cst_85 = arith.constant dense<0.000000e+00> : vector<4x80xf32>
    %61 = tpu.matmul %0, %60, %cst_85 {dimension_numbers = #tpu.dot_dimension_numbers<[1], [0], [0], [1], [0, 0, 1, 1], [], []>} : vector<4x18xbf16>, vector<18x80xbf16>, vector<4x80xf32> -> vector<4x80xf32>
    %c1_86 = arith.constant 1 : index
    %c0_87 = arith.constant 0 : index
    %c0_88 = arith.constant 0 : index
    %62 = vector.load %arg3[%c1_86, %c0_87, %c0_88] : memref<2x4x80xf32, #tpu.memory_space<vmem>>, vector<1x4x80xf32>
    %63 = vector.shape_cast %62 : vector<1x4x80xf32> to vector<4x80xf32>
    %64 = vector.shape_cast %61 : vector<4x80xf32> to vector<1x4x80xf32>
    tpu.vector_store %arg3[%c1_86, %c0_87, %c0_88], %64 {strides = array<i32>} : memref<2x4x80xf32, #tpu.memory_space<vmem>>, vector<1x4x80xf32>,
    return
  }
  func.func @transform_0(%arg0: i32) -> (i32, i32, i32) {
    %c0_i32 = arith.constant 0 : i32
    %c0_i32_0 = arith.constant 0 : i32
    %c0_i32_1 = arith.constant 0 : i32
    %c0_i32_2 = arith.constant 0 : i32
    return %c0_i32, %c0_i32_0, %c0_i32_1 : i32, i32, i32
  }
  func.func @transform_1(%arg0: i32) -> (i32, i32) {
    %c0_i32 = arith.constant 0 : i32
    %c0_i32_0 = arith.constant 0 : i32
    %c0_i32_1 = arith.constant 0 : i32
    return %c0_i32, %c0_i32_0 : i32, i32
  }
  func.func @transform_2(%arg0: i32) -> (i32, i32, i32) {
    %c0_i32 = arith.constant 0 : i32
    %c0_i32_0 = arith.constant 0 : i32
    %c0_i32_1 = arith.constant 0 : i32
    %c0_i32_2 = arith.constant 0 : i32
    return %c0_i32, %c0_i32_0, %c0_i32_1 : i32, i32, i32
  }
}

module attributes {stable_mosaic.version = 11 : i64} {
  func.func @kernel(%arg0: i32, %arg1: memref<2x2x342xbf16, #tpu.memory_space<vmem>>, %arg2: memref<2x18xbf16, #tpu.memory_space<vmem>>, %arg3: memref<2x2x288xf32, #tpu.memory_space<vmem>>, %arg4: memref<18x288xbf16, #tpu.memory_space<vmem>>) attributes {dimension_semantics = [#tpu.dimension_semantics<arbitrary>], iteration_bounds = array<i64: 1>, scalar_prefetch = 0 : i64, scratch_operands = 1 : i64, tpu.core_type = #tpu.core_type<tc>, window_params = [{pipeline_mode = #tpu.pipeline_mode<synchronous>, transform_indices = @transform_0, window_bounds = array<i64: 2, 2, 342>}, {pipeline_mode = #tpu.pipeline_mode<synchronous>, transform_indices = @transform_1, window_bounds = array<i64: 2, 18>}, {pipeline_mode = #tpu.pipeline_mode<synchronous>, transform_indices = @transform_2, window_bounds = array<i64: 2, 2, 288>}]} {
    %c0 = arith.constant 0 : index
    %c0_0 = arith.constant 0 : index
    %0 = vector.load %arg2[%c0, %c0_0] : memref<2x18xbf16, #tpu.memory_space<vmem>>, vector<2x18xbf16>
    %c0_1 = arith.constant 0 : index
    %c0_2 = arith.constant 0 : index
    %c0_3 = arith.constant 0 : index
    %1 = vector.load %arg1[%c0_1, %c0_2, %c0_3] : memref<2x2x342xbf16, #tpu.memory_space<vmem>>, vector<1x2x288xbf16>
    %2 = vector.shape_cast %1 : vector<1x2x288xbf16> to vector<2x288xbf16>
    %c0_4 = arith.constant 0 : index
    %c0_5 = arith.constant 0 : index
    %3 = vector.load %arg4[%c0_4, %c0_5] : memref<18x288xbf16, #tpu.memory_space<vmem>>, vector<2x288xbf16>
    tpu.vector_store %arg4[%c0_4, %c0_5], %2 {strides = array<i32>} : memref<18x288xbf16, #tpu.memory_space<vmem>>, vector<2x288xbf16>,
    %c0_6 = arith.constant 0 : index
    %c0_7 = arith.constant 0 : index
    %c1 = arith.constant 1 : index
    %4 = vector.load %arg1[%c0_6, %c0_7, %c1] : memref<2x2x342xbf16, #tpu.memory_space<vmem>>, vector<1x2x288xbf16>
    %5 = vector.shape_cast %4 : vector<1x2x288xbf16> to vector<2x288xbf16>
    %c2 = arith.constant 2 : index
    %c0_8 = arith.constant 0 : index
    %6 = vector.load %arg4[%c2, %c0_8] : memref<18x288xbf16, #tpu.memory_space<vmem>>, vector<2x288xbf16>
    tpu.vector_store %arg4[%c2, %c0_8], %5 {strides = array<i32>} : memref<18x288xbf16, #tpu.memory_space<vmem>>, vector<2x288xbf16>,
    %c0_9 = arith.constant 0 : index
    %c0_10 = arith.constant 0 : index
    %c2_11 = arith.constant 2 : index
    %7 = vector.load %arg1[%c0_9, %c0_10, %c2_11] : memref<2x2x342xbf16, #tpu.memory_space<vmem>>, vector<1x2x288xbf16>
    %8 = vector.shape_cast %7 : vector<1x2x288xbf16> to vector<2x288xbf16>
    %c4 = arith.constant 4 : index
    %c0_12 = arith.constant 0 : index
    %9 = vector.load %arg4[%c4, %c0_12] : memref<18x288xbf16, #tpu.memory_space<vmem>>, vector<2x288xbf16>
    tpu.vector_store %arg4[%c4, %c0_12], %8 {strides = array<i32>} : memref<18x288xbf16, #tpu.memory_space<vmem>>, vector<2x288xbf16>,
    %c0_13 = arith.constant 0 : index
    %c0_14 = arith.constant 0 : index
    %c18 = arith.constant 18 : index
    %10 = vector.load %arg1[%c0_13, %c0_14, %c18] : memref<2x2x342xbf16, #tpu.memory_space<vmem>>, vector<1x2x288xbf16>
    %11 = vector.shape_cast %10 : vector<1x2x288xbf16> to vector<2x288xbf16>
    %c6 = arith.constant 6 : index
    %c0_15 = arith.constant 0 : index
    %12 = vector.load %arg4[%c6, %c0_15] : memref<18x288xbf16, #tpu.memory_space<vmem>>, vector<2x288xbf16>
    tpu.vector_store %arg4[%c6, %c0_15], %11 {strides = array<i32>} : memref<18x288xbf16, #tpu.memory_space<vmem>>, vector<2x288xbf16>,
    %c0_16 = arith.constant 0 : index
    %c0_17 = arith.constant 0 : index
    %c19 = arith.constant 19 : index
    %13 = vector.load %arg1[%c0_16, %c0_17, %c19] : memref<2x2x342xbf16, #tpu.memory_space<vmem>>, vector<1x2x288xbf16>
    %14 = vector.shape_cast %13 : vector<1x2x288xbf16> to vector<2x288xbf16>
    %c8 = arith.constant 8 : index
    %c0_18 = arith.constant 0 : index
    %15 = vector.load %arg4[%c8, %c0_18] : memref<18x288xbf16, #tpu.memory_space<vmem>>, vector<2x288xbf16>
    tpu.vector_store %arg4[%c8, %c0_18], %14 {strides = array<i32>} : memref<18x288xbf16, #tpu.memory_space<vmem>>, vector<2x288xbf16>,
    %c0_19 = arith.constant 0 : index
    %c0_20 = arith.constant 0 : index
    %c20 = arith.constant 20 : index
    %16 = vector.load %arg1[%c0_19, %c0_20, %c20] : memref<2x2x342xbf16, #tpu.memory_space<vmem>>, vector<1x2x288xbf16>
    %17 = vector.shape_cast %16 : vector<1x2x288xbf16> to vector<2x288xbf16>
    %c10 = arith.constant 10 : index
    %c0_21 = arith.constant 0 : index
    %18 = vector.load %arg4[%c10, %c0_21] : memref<18x288xbf16, #tpu.memory_space<vmem>>, vector<2x288xbf16>
    tpu.vector_store %arg4[%c10, %c0_21], %17 {strides = array<i32>} : memref<18x288xbf16, #tpu.memory_space<vmem>>, vector<2x288xbf16>,
    %c0_22 = arith.constant 0 : index
    %c0_23 = arith.constant 0 : index
    %c36 = arith.constant 36 : index
    %19 = vector.load %arg1[%c0_22, %c0_23, %c36] : memref<2x2x342xbf16, #tpu.memory_space<vmem>>, vector<1x2x288xbf16>
    %20 = vector.shape_cast %19 : vector<1x2x288xbf16> to vector<2x288xbf16>
    %c12 = arith.constant 12 : index
    %c0_24 = arith.constant 0 : index
    %21 = vector.load %arg4[%c12, %c0_24] : memref<18x288xbf16, #tpu.memory_space<vmem>>, vector<2x288xbf16>
    tpu.vector_store %arg4[%c12, %c0_24], %20 {strides = array<i32>} : memref<18x288xbf16, #tpu.memory_space<vmem>>, vector<2x288xbf16>,
    %c0_25 = arith.constant 0 : index
    %c0_26 = arith.constant 0 : index
    %c37 = arith.constant 37 : index
    %22 = vector.load %arg1[%c0_25, %c0_26, %c37] : memref<2x2x342xbf16, #tpu.memory_space<vmem>>, vector<1x2x288xbf16>
    %23 = vector.shape_cast %22 : vector<1x2x288xbf16> to vector<2x288xbf16>
    %c14 = arith.constant 14 : index
    %c0_27 = arith.constant 0 : index
    %24 = vector.load %arg4[%c14, %c0_27] : memref<18x288xbf16, #tpu.memory_space<vmem>>, vector<2x288xbf16>
    tpu.vector_store %arg4[%c14, %c0_27], %23 {strides = array<i32>} : memref<18x288xbf16, #tpu.memory_space<vmem>>, vector<2x288xbf16>,
    %c0_28 = arith.constant 0 : index
    %c0_29 = arith.constant 0 : index
    %c38 = arith.constant 38 : index
    %25 = vector.load %arg1[%c0_28, %c0_29, %c38] : memref<2x2x342xbf16, #tpu.memory_space<vmem>>, vector<1x2x288xbf16>
    %26 = vector.shape_cast %25 : vector<1x2x288xbf16> to vector<2x288xbf16>
    %c16 = arith.constant 16 : index
    %c0_30 = arith.constant 0 : index
    %27 = vector.load %arg4[%c16, %c0_30] : memref<18x288xbf16, #tpu.memory_space<vmem>>, vector<2x288xbf16>
    tpu.vector_store %arg4[%c16, %c0_30], %26 {strides = array<i32>} : memref<18x288xbf16, #tpu.memory_space<vmem>>, vector<2x288xbf16>,
    %c0_31 = arith.constant 0 : index
    %c0_32 = arith.constant 0 : index
    %28 = vector.load %arg4[%c0_31, %c0_32] : memref<18x288xbf16, #tpu.memory_space<vmem>>, vector<18x288xbf16>
    %cst = arith.constant dense<0.000000e+00> : vector<2x288xf32>
    %29 = tpu.matmul %0, %28, %cst {dimension_numbers = #tpu.dot_dimension_numbers<[1], [0], [0], [1], [0, 0, 1, 1], [], []>} : vector<2x18xbf16>, vector<18x288xbf16>, vector<2x288xf32> -> vector<2x288xf32>
    %c0_33 = arith.constant 0 : index
    %c0_34 = arith.constant 0 : index
    %c0_35 = arith.constant 0 : index
    %30 = vector.load %arg3[%c0_33, %c0_34, %c0_35] : memref<2x2x288xf32, #tpu.memory_space<vmem>>, vector<1x2x288xf32>
    %31 = vector.shape_cast %30 : vector<1x2x288xf32> to vector<2x288xf32>
    %32 = vector.shape_cast %29 : vector<2x288xf32> to vector<1x2x288xf32>
    tpu.vector_store %arg3[%c0_33, %c0_34, %c0_35], %32 {strides = array<i32>} : memref<2x2x288xf32, #tpu.memory_space<vmem>>, vector<1x2x288xf32>,
    %c1_36 = arith.constant 1 : index
    %c0_37 = arith.constant 0 : index
    %c0_38 = arith.constant 0 : index
    %33 = vector.load %arg1[%c1_36, %c0_37, %c0_38] : memref<2x2x342xbf16, #tpu.memory_space<vmem>>, vector<1x2x288xbf16>
    %34 = vector.shape_cast %33 : vector<1x2x288xbf16> to vector<2x288xbf16>
    %c0_39 = arith.constant 0 : index
    %c0_40 = arith.constant 0 : index
    %35 = vector.load %arg4[%c0_39, %c0_40] : memref<18x288xbf16, #tpu.memory_space<vmem>>, vector<2x288xbf16>
    tpu.vector_store %arg4[%c0_39, %c0_40], %34 {strides = array<i32>} : memref<18x288xbf16, #tpu.memory_space<vmem>>, vector<2x288xbf16>,
    %c1_41 = arith.constant 1 : index
    %c0_42 = arith.constant 0 : index
    %c1_43 = arith.constant 1 : index
    %36 = vector.load %arg1[%c1_41, %c0_42, %c1_43] : memref<2x2x342xbf16, #tpu.memory_space<vmem>>, vector<1x2x288xbf16>
    %37 = vector.shape_cast %36 : vector<1x2x288xbf16> to vector<2x288xbf16>
    %c2_44 = arith.constant 2 : index
    %c0_45 = arith.constant 0 : index
    %38 = vector.load %arg4[%c2_44, %c0_45] : memref<18x288xbf16, #tpu.memory_space<vmem>>, vector<2x288xbf16>
    tpu.vector_store %arg4[%c2_44, %c0_45], %37 {strides = array<i32>} : memref<18x288xbf16, #tpu.memory_space<vmem>>, vector<2x288xbf16>,
    %c1_46 = arith.constant 1 : index
    %c0_47 = arith.constant 0 : index
    %c2_48 = arith.constant 2 : index
    %39 = vector.load %arg1[%c1_46, %c0_47, %c2_48] : memref<2x2x342xbf16, #tpu.memory_space<vmem>>, vector<1x2x288xbf16>
    %40 = vector.shape_cast %39 : vector<1x2x288xbf16> to vector<2x288xbf16>
    %c4_49 = arith.constant 4 : index
    %c0_50 = arith.constant 0 : index
    %41 = vector.load %arg4[%c4_49, %c0_50] : memref<18x288xbf16, #tpu.memory_space<vmem>>, vector<2x288xbf16>
    tpu.vector_store %arg4[%c4_49, %c0_50], %40 {strides = array<i32>} : memref<18x288xbf16, #tpu.memory_space<vmem>>, vector<2x288xbf16>,
    %c1_51 = arith.constant 1 : index
    %c0_52 = arith.constant 0 : index
    %c18_53 = arith.constant 18 : index
    %42 = vector.load %arg1[%c1_51, %c0_52, %c18_53] : memref<2x2x342xbf16, #tpu.memory_space<vmem>>, vector<1x2x288xbf16>
    %43 = vector.shape_cast %42 : vector<1x2x288xbf16> to vector<2x288xbf16>
    %c6_54 = arith.constant 6 : index
    %c0_55 = arith.constant 0 : index
    %44 = vector.load %arg4[%c6_54, %c0_55] : memref<18x288xbf16, #tpu.memory_space<vmem>>, vector<2x288xbf16>
    tpu.vector_store %arg4[%c6_54, %c0_55], %43 {strides = array<i32>} : memref<18x288xbf16, #tpu.memory_space<vmem>>, vector<2x288xbf16>,
    %c1_56 = arith.constant 1 : index
    %c0_57 = arith.constant 0 : index
    %c19_58 = arith.constant 19 : index
    %45 = vector.load %arg1[%c1_56, %c0_57, %c19_58] : memref<2x2x342xbf16, #tpu.memory_space<vmem>>, vector<1x2x288xbf16>
    %46 = vector.shape_cast %45 : vector<1x2x288xbf16> to vector<2x288xbf16>
    %c8_59 = arith.constant 8 : index
    %c0_60 = arith.constant 0 : index
    %47 = vector.load %arg4[%c8_59, %c0_60] : memref<18x288xbf16, #tpu.memory_space<vmem>>, vector<2x288xbf16>
    tpu.vector_store %arg4[%c8_59, %c0_60], %46 {strides = array<i32>} : memref<18x288xbf16, #tpu.memory_space<vmem>>, vector<2x288xbf16>,
    %c1_61 = arith.constant 1 : index
    %c0_62 = arith.constant 0 : index
    %c20_63 = arith.constant 20 : index
    %48 = vector.load %arg1[%c1_61, %c0_62, %c20_63] : memref<2x2x342xbf16, #tpu.memory_space<vmem>>, vector<1x2x288xbf16>
    %49 = vector.shape_cast %48 : vector<1x2x288xbf16> to vector<2x288xbf16>
    %c10_64 = arith.constant 10 : index
    %c0_65 = arith.constant 0 : index
    %50 = vector.load %arg4[%c10_64, %c0_65] : memref<18x288xbf16, #tpu.memory_space<vmem>>, vector<2x288xbf16>
    tpu.vector_store %arg4[%c10_64, %c0_65], %49 {strides = array<i32>} : memref<18x288xbf16, #tpu.memory_space<vmem>>, vector<2x288xbf16>,
    %c1_66 = arith.constant 1 : index
    %c0_67 = arith.constant 0 : index
    %c36_68 = arith.constant 36 : index
    %51 = vector.load %arg1[%c1_66, %c0_67, %c36_68] : memref<2x2x342xbf16, #tpu.memory_space<vmem>>, vector<1x2x288xbf16>
    %52 = vector.shape_cast %51 : vector<1x2x288xbf16> to vector<2x288xbf16>
    %c12_69 = arith.constant 12 : index
    %c0_70 = arith.constant 0 : index
    %53 = vector.load %arg4[%c12_69, %c0_70] : memref<18x288xbf16, #tpu.memory_space<vmem>>, vector<2x288xbf16>
    tpu.vector_store %arg4[%c12_69, %c0_70], %52 {strides = array<i32>} : memref<18x288xbf16, #tpu.memory_space<vmem>>, vector<2x288xbf16>,
    %c1_71 = arith.constant 1 : index
    %c0_72 = arith.constant 0 : index
    %c37_73 = arith.constant 37 : index
    %54 = vector.load %arg1[%c1_71, %c0_72, %c37_73] : memref<2x2x342xbf16, #tpu.memory_space<vmem>>, vector<1x2x288xbf16>
    %55 = vector.shape_cast %54 : vector<1x2x288xbf16> to vector<2x288xbf16>
    %c14_74 = arith.constant 14 : index
    %c0_75 = arith.constant 0 : index
    %56 = vector.load %arg4[%c14_74, %c0_75] : memref<18x288xbf16, #tpu.memory_space<vmem>>, vector<2x288xbf16>
    tpu.vector_store %arg4[%c14_74, %c0_75], %55 {strides = array<i32>} : memref<18x288xbf16, #tpu.memory_space<vmem>>, vector<2x288xbf16>,
    %c1_76 = arith.constant 1 : index
    %c0_77 = arith.constant 0 : index
    %c38_78 = arith.constant 38 : index
    %57 = vector.load %arg1[%c1_76, %c0_77, %c38_78] : memref<2x2x342xbf16, #tpu.memory_space<vmem>>, vector<1x2x288xbf16>
    %58 = vector.shape_cast %57 : vector<1x2x288xbf16> to vector<2x288xbf16>
    %c16_79 = arith.constant 16 : index
    %c0_80 = arith.constant 0 : index
    %59 = vector.load %arg4[%c16_79, %c0_80] : memref<18x288xbf16, #tpu.memory_space<vmem>>, vector<2x288xbf16>
    tpu.vector_store %arg4[%c16_79, %c0_80], %58 {strides = array<i32>} : memref<18x288xbf16, #tpu.memory_space<vmem>>, vector<2x288xbf16>,
    %c0_81 = arith.constant 0 : index
    %c0_82 = arith.constant 0 : index
    %60 = vector.load %arg4[%c0_81, %c0_82] : memref<18x288xbf16, #tpu.memory_space<vmem>>, vector<18x288xbf16>
    %cst_83 = arith.constant dense<0.000000e+00> : vector<2x288xf32>
    %61 = tpu.matmul %0, %60, %cst_83 {dimension_numbers = #tpu.dot_dimension_numbers<[1], [0], [0], [1], [0, 0, 1, 1], [], []>} : vector<2x18xbf16>, vector<18x288xbf16>, vector<2x288xf32> -> vector<2x288xf32>
    %c1_84 = arith.constant 1 : index
    %c0_85 = arith.constant 0 : index
    %c0_86 = arith.constant 0 : index
    %62 = vector.load %arg3[%c1_84, %c0_85, %c0_86] : memref<2x2x288xf32, #tpu.memory_space<vmem>>, vector<1x2x288xf32>
    %63 = vector.shape_cast %62 : vector<1x2x288xf32> to vector<2x288xf32>
    %64 = vector.shape_cast %61 : vector<2x288xf32> to vector<1x2x288xf32>
    tpu.vector_store %arg3[%c1_84, %c0_85, %c0_86], %64 {strides = array<i32>} : memref<2x2x288xf32, #tpu.memory_space<vmem>>, vector<1x2x288xf32>,
    return
  }
  func.func @transform_0(%arg0: i32) -> (i32, i32, i32) {
    %c0_i32 = arith.constant 0 : i32
    %c0_i32_0 = arith.constant 0 : i32
    %c0_i32_1 = arith.constant 0 : i32
    %c0_i32_2 = arith.constant 0 : i32
    return %c0_i32, %c0_i32_0, %c0_i32_1 : i32, i32, i32
  }
  func.func @transform_1(%arg0: i32) -> (i32, i32) {
    %c0_i32 = arith.constant 0 : i32
    %c0_i32_0 = arith.constant 0 : i32
    %c0_i32_1 = arith.constant 0 : i32
    return %c0_i32, %c0_i32_0 : i32, i32
  }
  func.func @transform_2(%arg0: i32) -> (i32, i32, i32) {
    %c0_i32 = arith.constant 0 : i32
    %c0_i32_0 = arith.constant 0 : i32
    %c0_i32_1 = arith.constant 0 : i32
    %c0_i32_2 = arith.constant 0 : i32
    return %c0_i32, %c0_i32_0, %c0_i32_1 : i32, i32, i32
  }
}

</mosaic_0001>

<bundles_post_ra>
// kernel: a_call__.5
= control target key start
LH: loop header
LB: loop body
LE: loop exit
PB: predicated region body
PF: predicated region fallthrough
CT: control target
= control target key end

     0   :  { %v29_v0 = vlaneseq  ;;  %v550_v1 = vmov 1935823168   ;;  %s551_s19 = smov 117   ;;  %s552_s20 = smov 127   ;;  %vm14_vm0 = vcmask 647168   ;;  %v557_v31 = vmov 0.0   ;;  %s657_s0 = inlined_call_operand.vmem [shape: bf16[2,2,110], index: 0, kind: input, shape index: {}]   ;;  %s658_s1 = inlined_call_operand.vmem [shape: bf16[4,18], index: 1, kind: input, shape index: {}]   ;;  %s659_s2 = inlined_call_operand.vmem [shape: f32[2,4,80], index: 2, kind: output, shape index: {}]  }
   0x1   :  { %v27_v2 = vunpack.c.l.s4 %v550_v1  ;;  %v482_v3 = vld.sshfl [vmem:[%s657_s0] sm:$0x1 pattern:$0x73625140]  ;;  %s553_s27 = smov 108   ;;  %s554_s28 = smov 116   ;;  %511 = vmatprep.subr.bf16.mxu0 %v557_v31  ;;  %519 = vmatprep.subr.bf16.mxu1 %v557_v31 }
   0x2   :  { %v30_v4 = vshrl.u32 %v29_v0, 7  ;;  %v538_v5 = vld [vmem:[%s657_s0] ss:$0 sps:$4 sm:$0x11]   ;;  %v25_v7 = vcombine.low %v482_v3, %v482_v3  ;;  %s555_s3 = smov 106   ;;  %s556_s4 = smov 126  }
   0x3   :  { %v28_v6 = vunpack.c.0.s8 %v27_v2  ;;  %v539_v8 = vld [vmem:[%s657_s0] ss:$0 sps:$4 sm:$0x11]   ;;  %v542_v21 = vld [vmem:[%s657_s0 + $0x1] ss:$0 sps:$4 sm:$0x11]  }
   0x4   :  { %v540_v9 = vld [vmem:[%s657_s0] ss:$0 sps:$4 sm:$0x11]   ;;  %v543_v25 = vld [vmem:[%s657_s0 + $0x1] ss:$0 sps:$4 sm:$0x11]  }
   0x5   :  { %v31_v10 = vsub.s32 %v28_v6, %v30_v4  ;;  %v541_v11 = vld [vmem:[%s657_s0] ss:$0 sps:$4 sm:$0x11]   ;;  %s558_s5 = smov 118   ;;  %s559_s6 = smov 107   ;;  %vm560_vm1 = vmmov 0  }
   0x6   :  { %v490_v19 = vld.sshfl [vmem:[%s657_s0 + $0x1] sm:$0x1 pattern:$0x73625140]  ;;  %v13_v20 = vld [vmem:[%s657_s0] sm:$0x1]  ;;  %515 = vmatprep.mubr.msk.bf16.mxu0 %vm560_vm1, %v557_v31  ;;  %523 = vmatprep.mubr.msk.bf16.mxu1 %vm560_vm1, %v557_v31 }
   0x7   :  { %v98_v12 = vrot.slane %v482_v3, %v31_v10  ;;  %v32_v13 = vrot.slane %v25_v7, %v31_v10  ;;  %v133_v14 = vrot.slane %v538_v5, %v31_v10  ;;  %v47_v15 = vrot.slane %v539_v8, %v31_v10  ;;  %15 = vst.msk [vmem:[#allocation2] sm:$0x1] %vm14_vm0, %v13_v20  ;;  %v544_v35 = vld [vmem:[%s657_s0 + $0x1] ss:$0 sps:$4 sm:$0x11]  }
   0x8   :  { %v69_v17 = vrot.slane %v540_v9, %v31_v10  ;;  %v154_v18 = vrot.slane %v541_v11, %v31_v10  ;;  %v261_v26 = vcombine.low %v490_v19, %v490_v19  ;;  %v282_v27 = vrot.slane %v542_v21, %v31_v10  ;;  %v545_v36 = vld [vmem:[%s657_s0 + $0x1] ss:$0 sps:$4 sm:$0x11]  }
   0x9   :  { %99 = vrot.lane.b32.xlu1 %v98_v12, %s551_s19  ;;  %33 = vrot.lane.b32.xlu0 %v32_v13, %s552_s20  ;;  %v140_v16 = vrot.slane %v133_v14, %v31_v10  ;;  %v54_v22 = vrot.slane %v47_v15, %v31_v10  ;;  %v303_v30 = vrot.slane %v543_v25, %v31_v10  ;;  %vm36_vm2 = vcmask 648193   ;;  %v488_v54 = vld [vmem:[%s657_s0 + $0x1] sm:$0x1] }
   0xa   :  { %v70_v23 = vcombine.low %v69_v17, %v69_v17  ;;  %v155_v24 = vcombine.low %v154_v18, %v154_v18  ;;  %v268_v32 = vrot.slane %v261_v26, %v31_v10  ;;  %v289_v33 = vrot.slane %v282_v27, %v31_v10  ;;  %v12_v62 = vld [vmem:[%s658_s1] sm:$0x3] }
   0xb   :  { %v304_v34 = vcombine.low %v303_v30, %v303_v30  ;;  %v331_v37 = vrot.slane %v490_v19, %v31_v10  ;;  %v366_v39 = vrot.slane %v544_v35, %v31_v10  ;;  %v387_v40 = vrot.slane %v545_v36, %v31_v10 }
   0xc   :  { %v77_v28 = vrot.slane %v70_v23, %v31_v10  ;;  %v162_v29 = vrot.slane %v155_v24, %v31_v10  ;;  %vm58_vm3 = vcmask 649218   ;;  %vm81_vm4 = vcmask 650243  }
   0xd   :  { %141 = vrot.lane.b32.xlu1 %v140_v16, %s553_s27  ;;  %120 = vrot.lane.b32.xlu0 %v32_v13, %s554_s28  ;;  %v311_v38 = vrot.slane %v304_v34, %v31_v10  ;;  %v373_v41 = vrot.slane %v366_v39, %v31_v10  ;;  %v388_v42 = vcombine.low %v387_v40, %v387_v40  ;;  %vm203_vm5 = vcmask 1040384  }
   0xe   :  { %vm199_vm6 = vcmask 146432   ;;  %vm247_vm7 = vcmask 650240  }
   0xf   :  { %v395_v43 = vrot.slane %v388_v42, %v31_v10 }
  0x11   :  { %183 = vrot.lane.b32.xlu1 %v98_v12, %s555_s3  ;;  %55 = vrot.lane.b32.xlu0 %v54_v22, %s556_s4 }
  0x15   :  { %78 = vrot.lane.b32.xlu1 %v77_v28, %s558_s5  ;;  %163 = vrot.lane.b32.xlu0 %v162_v29, %s559_s6 }
  0x19   :  { %269 = vrot.lane.b32.xlu0 %v268_v32, %s552_s20  ;;  %290 = vrot.lane.b32.xlu1 %v289_v33, %s556_s4 }
  0x1d   :  { %312 = vrot.lane.b32.xlu0 %v311_v38, %s558_s5  ;;  %332 = vrot.lane.b32.xlu1 %v331_v37, %s551_s19 }
  0x21   :  { %353 = vrot.lane.b32.xlu0 %v268_v32, %s554_s28  ;;  %374 = vrot.lane.b32.xlu1 %v373_v41, %s553_s27 }
  0x25   :  { %396 = vrot.lane.b32.xlu0 %v395_v43, %s559_s6  ;;  %416 = vrot.lane.b32.xlu1 %v331_v37, %s555_s3 }
  0x7b   :  { %v100_v44 = vpop.permute.xlu1 %99  ;;  %v34_v45 = vpop.permute.xlu0 %33 }
  0x7c   :  { %102 = vst.msk [vmem:[#allocation2 + $0x4] sm:$0x1] %vm14_vm0, %v100_v44 }
  0x7d   :  { %37 = vst.msk [vmem:[#allocation2] sm:$0x2] %vm36_vm2, %v34_v45 }
  0x7f   :  { %v142_v46 = vpop.permute.xlu1 %141  ;;  %v121_v47 = vpop.permute.xlu0 %120 }
  0x80   :  { %144 = vst.msk [vmem:[#allocation2 + $0x4] sm:$0x4] %vm58_vm3, %v142_v46 }
  0x81   :  { %123 = vst.msk [vmem:[#allocation2 + $0x4] sm:$0x2] %vm36_vm2, %v121_v47 }
  0x83   :  { %v184_v48 = vpop.permute.xlu1 %183  ;;  %v56_v49 = vpop.permute.xlu0 %55 }
  0x84   :  { %186 = vst.msk [vmem:[#allocation2 + $0x8] sm:$0x1] %vm14_vm0, %v184_v48 }
  0x85   :  { %59 = vst.msk [vmem:[#allocation2] sm:$0x4] %vm58_vm3, %v56_v49 }
  0x87   :  { %v79_v50 = vpop.permute.xlu1 %78  ;;  %v164_v51 = vpop.permute.xlu0 %163 }
  0x88   :  { %82 = vst.msk [vmem:[#allocation2] sm:$0x8] %vm81_vm4, %v79_v50  ;;  %166 = vst.msk [vmem:[#allocation2 + $0x4] sm:$0x8] %vm81_vm4, %v164_v51 }
  0x8b   :  { %v270_v52 = vpop.permute.xlu0 %269  ;;  %v291_v53 = vpop.permute.xlu1 %290  ;;  %v546_v58 = vld [vmem:[#allocation2 + $0x8] ss:$0 sps:$4 sm:$0x11]  }
  0x8c   :  { %v205_v61 = vsel %vm203_vm5, %v546_v58, 0 }
  0x8f   :  { %v187_v55 = vld [vmem:[#allocation2] sm:$0xff]   ;;  %v313_v56 = vpop.permute.xlu0 %312  ;;  %v333_v57 = vpop.permute.xlu1 %332 }
  0x90   :  { %251 = vst.msk [vmem:[#allocation2] sm:$0x1] %vm14_vm0, %v488_v54  ;;  %335 = vst.msk [vmem:[#allocation2 + $0x4] sm:$0x1] %vm14_vm0, %v333_v57  ;;  %512 = vmatpush3.bf16.msra.mxu0 %v187_v55 }
  0x91   :  { %272 = vst.msk [vmem:[#allocation2] sm:$0x2] %vm36_vm2, %v270_v52  ;;  %513 = vmatprep.subr.bf16.mxu0 %v557_v31 }
  0x92   :  { %293 = vst.msk [vmem:[#allocation2] sm:$0x4] %vm58_vm3, %v291_v53 }
  0x93   :  { %315 = vst.msk [vmem:[#allocation2] sm:$0x8] %vm81_vm4, %v313_v56  ;;  %v354_v59 = vpop.permute.xlu0 %353  ;;  %v375_v60 = vpop.permute.xlu1 %374 }
  0x94   :  { %356 = vst.msk [vmem:[#allocation2 + $0x4] sm:$0x2] %vm36_vm2, %v354_v59  ;;  %514 = vmatpush3.bf16.msra.mxu0 %v205_v61 }
  0x95   :  { %377 = vst.msk [vmem:[#allocation2 + $0x4] sm:$0x4] %vm58_vm3, %v375_v60 }
  0x97   :  { %v397_v63 = vpop.permute.xlu0 %396  ;;  %v417_v0 = vpop.permute.xlu1 %416  ;;  %516 = vmatmul.mubr.msk.bf16.vlgmr.msra.gmra.mrb[0].mxu0 %vm199_vm6, %v12_v62 }
  0x98   :  { %399 = vst.msk [vmem:[#allocation2 + $0x4] sm:$0x8] %vm81_vm4, %v397_v63 }
  0x99   :  { %419 = vst.msk [vmem:[#allocation2 + $0x8] sm:$0x1] %vm14_vm0, %v417_v0 }
  0x9f   :  { %v547_v1 = vld [vmem:[#allocation2] sm:$0xff]  }
  0xa0   :  { %v548_v2 = vld [vmem:[#allocation2 + $0x8] ss:$0 sps:$4 sm:$0x11]   ;;  %520 = vmatpush3.bf16.msra.mxu1 %v547_v1 }
  0xa1   :  { %521 = vmatprep.subr.bf16.mxu1 %v557_v31  ;;  %v433_v3 = vsel %vm203_vm5, %v548_v2, 0 }
  0xa4   :  { %522 = vmatpush3.bf16.msra.mxu1 %v433_v3 }
  0xa7   :  { %524 = vmatmul.mubr.msk.bf16.vlgmr.msra.gmra.mrb[0].mxu1 %vm199_vm6, %v12_v62 }
 0x16a   :  { %v241_v4 = vpop.f32.mrb[0].mxu0 }
 0x16b   :  { %248 = vst.msk [vmem:[%s659_s2] sm:$0xf] %vm247_vm7, %v241_v4  ;;  %v517_v5 = vpop.f32.mrb[1].mxu0 }
 0x16c   :  { %v244_v6 = vpop.f32.mrb[2].mxu0 }
 0x16d   :  { %v518_v7 = vpop.f32.mrb[3].mxu0 }
 0x17a   :  { %v469_v8 = vpop.f32.mrb[0].mxu1 }
 0x17b   :  { %504 = vst.msk [vmem:[%s659_s2 + $0x4] sm:$0xf] %vm247_vm7, %v469_v8  ;;  %v525_v9 = vpop.f32.mrb[1].mxu1 }
 0x17c   :  { %v472_v10 = vpop.f32.mrb[2].mxu1 }
 0x17d   :  { %v526_v11 = vpop.f32.mrb[3].mxu1 }

// kernel: a_call__.4
= control target key start
LH: loop header
LB: loop body
LE: loop exit
PB: predicated region body
PF: predicated region fallthrough
CT: control target
= control target key end

     0   :  { %v29_v0 = vlaneseq  ;;  %v550_v1 = vmov 1935823168   ;;  %s551_s19 = smov 117   ;;  %s552_s20 = smov 127   ;;  %vm14_vm0 = vcmask 647168   ;;  %v557_v31 = vmov 0.0   ;;  %s657_s0 = inlined_call_operand.vmem [shape: bf16[2,2,110], index: 0, kind: input, shape index: {}]   ;;  %s658_s1 = inlined_call_operand.vmem [shape: bf16[2,18], index: 1, kind: input, shape index: {}]   ;;  %s659_s2 = inlined_call_operand.vmem [shape: f32[2,2,80], index: 2, kind: output, shape index: {}]  }
   0x1   :  { %v27_v2 = vunpack.c.l.s4 %v550_v1  ;;  %v482_v3 = vld.sshfl [vmem:[%s657_s0] sm:$0x1 pattern:$0x73625140]  ;;  %s553_s27 = smov 108   ;;  %s554_s28 = smov 116   ;;  %511 = vmatprep.subr.bf16.mxu0 %v557_v31  ;;  %519 = vmatprep.subr.bf16.mxu1 %v557_v31 }
   0x2   :  { %v30_v4 = vshrl.u32 %v29_v0, 7  ;;  %v538_v5 = vld [vmem:[%s657_s0] ss:$0 sps:$4 sm:$0x11]   ;;  %v25_v7 = vcombine.low %v482_v3, %v482_v3  ;;  %s555_s3 = smov 106   ;;  %s556_s4 = smov 126  }
   0x3   :  { %v28_v6 = vunpack.c.0.s8 %v27_v2  ;;  %v539_v8 = vld [vmem:[%s657_s0] ss:$0 sps:$4 sm:$0x11]   ;;  %v542_v21 = vld [vmem:[%s657_s0 + $0x1] ss:$0 sps:$4 sm:$0x11]  }
   0x4   :  { %v540_v9 = vld [vmem:[%s657_s0] ss:$0 sps:$4 sm:$0x11]   ;;  %v543_v25 = vld [vmem:[%s657_s0 + $0x1] ss:$0 sps:$4 sm:$0x11]  }
   0x5   :  { %v31_v10 = vsub.s32 %v28_v6, %v30_v4  ;;  %v541_v11 = vld [vmem:[%s657_s0] ss:$0 sps:$4 sm:$0x11]   ;;  %s558_s5 = smov 118   ;;  %s559_s6 = smov 107   ;;  %vm560_vm1 = vmmov 0  }
   0x6   :  { %v490_v19 = vld.sshfl [vmem:[%s657_s0 + $0x1] sm:$0x1 pattern:$0x73625140]  ;;  %v13_v20 = vld [vmem:[%s657_s0] sm:$0x1]  ;;  %515 = vmatprep.mubr.msk.bf16.mxu0 %vm560_vm1, %v557_v31  ;;  %523 = vmatprep.mubr.msk.bf16.mxu1 %vm560_vm1, %v557_v31 }
   0x7   :  { %v98_v12 = vrot.slane %v482_v3, %v31_v10  ;;  %v32_v13 = vrot.slane %v25_v7, %v31_v10  ;;  %v133_v14 = vrot.slane %v538_v5, %v31_v10  ;;  %v47_v15 = vrot.slane %v539_v8, %v31_v10  ;;  %15 = vst.msk [vmem:[#allocation2] sm:$0x1] %vm14_vm0, %v13_v20  ;;  %v544_v35 = vld [vmem:[%s657_s0 + $0x1] ss:$0 sps:$4 sm:$0x11]  }
   0x8   :  { %v69_v17 = vrot.slane %v540_v9, %v31_v10  ;;  %v154_v18 = vrot.slane %v541_v11, %v31_v10  ;;  %v261_v26 = vcombine.low %v490_v19, %v490_v19  ;;  %v282_v27 = vrot.slane %v542_v21, %v31_v10  ;;  %v545_v36 = vld [vmem:[%s657_s0 + $0x1] ss:$0 sps:$4 sm:$0x11]   ;;  %v12_v62 = vld [vmem:[%s658_s1] sm:$0x1] }
   0x9   :  { %99 = vrot.lane.b32.xlu1 %v98_v12, %s551_s19  ;;  %33 = vrot.lane.b32.xlu0 %v32_v13, %s552_s20  ;;  %v140_v16 = vrot.slane %v133_v14, %v31_v10  ;;  %v54_v22 = vrot.slane %v47_v15, %v31_v10  ;;  %v303_v30 = vrot.slane %v543_v25, %v31_v10  ;;  %vm36_vm2 = vcmask 648193   ;;  %v488_v54 = vld [vmem:[%s657_s0 + $0x1] sm:$0x1] }
   0xa   :  { %v70_v23 = vcombine.low %v69_v17, %v69_v17  ;;  %v155_v24 = vcombine.low %v154_v18, %v154_v18  ;;  %v268_v32 = vrot.slane %v261_v26, %v31_v10  ;;  %v289_v33 = vrot.slane %v282_v27, %v31_v10 }
   0xb   :  { %v304_v34 = vcombine.low %v303_v30, %v303_v30  ;;  %v331_v37 = vrot.slane %v490_v19, %v31_v10  ;;  %v366_v39 = vrot.slane %v544_v35, %v31_v10  ;;  %v387_v40 = vrot.slane %v545_v36, %v31_v10 }
   0xc   :  { %v77_v28 = vrot.slane %v70_v23, %v31_v10  ;;  %v162_v29 = vrot.slane %v155_v24, %v31_v10  ;;  %vm58_vm3 = vcmask 649218   ;;  %vm81_vm4 = vcmask 650243  }
   0xd   :  { %141 = vrot.lane.b32.xlu1 %v140_v16, %s553_s27  ;;  %120 = vrot.lane.b32.xlu0 %v32_v13, %s554_s28  ;;  %v311_v38 = vrot.slane %v304_v34, %v31_v10  ;;  %v373_v41 = vrot.slane %v366_v39, %v31_v10  ;;  %v388_v42 = vcombine.low %v387_v40, %v387_v40  ;;  %vm203_vm5 = vcmask 1040384  }
   0xe   :  { %vm199_vm6 = vcmask 146432   ;;  %vm247_vm7 = vcmask 648192  }
   0xf   :  { %v395_v43 = vrot.slane %v388_v42, %v31_v10 }
  0x11   :  { %183 = vrot.lane.b32.xlu1 %v98_v12, %s555_s3  ;;  %55 = vrot.lane.b32.xlu0 %v54_v22, %s556_s4 }
  0x15   :  { %78 = vrot.lane.b32.xlu1 %v77_v28, %s558_s5  ;;  %163 = vrot.lane.b32.xlu0 %v162_v29, %s559_s6 }
  0x19   :  { %269 = vrot.lane.b32.xlu0 %v268_v32, %s552_s20  ;;  %290 = vrot.lane.b32.xlu1 %v289_v33, %s556_s4 }
  0x1d   :  { %312 = vrot.lane.b32.xlu0 %v311_v38, %s558_s5  ;;  %332 = vrot.lane.b32.xlu1 %v331_v37, %s551_s19 }
  0x21   :  { %353 = vrot.lane.b32.xlu0 %v268_v32, %s554_s28  ;;  %374 = vrot.lane.b32.xlu1 %v373_v41, %s553_s27 }
  0x25   :  { %396 = vrot.lane.b32.xlu0 %v395_v43, %s559_s6  ;;  %416 = vrot.lane.b32.xlu1 %v331_v37, %s555_s3 }
  0x7b   :  { %v100_v44 = vpop.permute.xlu1 %99  ;;  %v34_v45 = vpop.permute.xlu0 %33 }
  0x7c   :  { %102 = vst.msk [vmem:[#allocation2 + $0x4] sm:$0x1] %vm14_vm0, %v100_v44 }
  0x7d   :  { %37 = vst.msk [vmem:[#allocation2] sm:$0x2] %vm36_vm2, %v34_v45 }
  0x7f   :  { %v142_v46 = vpop.permute.xlu1 %141  ;;  %v121_v47 = vpop.permute.xlu0 %120 }
  0x80   :  { %144 = vst.msk [vmem:[#allocation2 + $0x4] sm:$0x4] %vm58_vm3, %v142_v46 }
  0x81   :  { %123 = vst.msk [vmem:[#allocation2 + $0x4] sm:$0x2] %vm36_vm2, %v121_v47 }
  0x83   :  { %v184_v48 = vpop.permute.xlu1 %183  ;;  %v56_v49 = vpop.permute.xlu0 %55 }
  0x84   :  { %186 = vst.msk [vmem:[#allocation2 + $0x8] sm:$0x1] %vm14_vm0, %v184_v48 }
  0x85   :  { %59 = vst.msk [vmem:[#allocation2] sm:$0x4] %vm58_vm3, %v56_v49 }
  0x87   :  { %v79_v50 = vpop.permute.xlu1 %78  ;;  %v164_v51 = vpop.permute.xlu0 %163 }
  0x88   :  { %82 = vst.msk [vmem:[#allocation2] sm:$0x8] %vm81_vm4, %v79_v50  ;;  %166 = vst.msk [vmem:[#allocation2 + $0x4] sm:$0x8] %vm81_vm4, %v164_v51 }
  0x8b   :  { %v270_v52 = vpop.permute.xlu0 %269  ;;  %v291_v53 = vpop.permute.xlu1 %290  ;;  %v546_v58 = vld [vmem:[#allocation2 + $0x8] ss:$0 sps:$4 sm:$0x11]  }
  0x8c   :  { %v205_v61 = vsel %vm203_vm5, %v546_v58, 0 }
  0x8f   :  { %v187_v55 = vld [vmem:[#allocation2] sm:$0xff]   ;;  %v313_v56 = vpop.permute.xlu0 %312  ;;  %v333_v57 = vpop.permute.xlu1 %332 }
  0x90   :  { %251 = vst.msk [vmem:[#allocation2] sm:$0x1] %vm14_vm0, %v488_v54  ;;  %335 = vst.msk [vmem:[#allocation2 + $0x4] sm:$0x1] %vm14_vm0, %v333_v57  ;;  %512 = vmatpush3.bf16.msra.mxu0 %v187_v55 }
  0x91   :  { %272 = vst.msk [vmem:[#allocation2] sm:$0x2] %vm36_vm2, %v270_v52  ;;  %513 = vmatprep.subr.bf16.mxu0 %v557_v31 }
  0x92   :  { %293 = vst.msk [vmem:[#allocation2] sm:$0x4] %vm58_vm3, %v291_v53 }
  0x93   :  { %315 = vst.msk [vmem:[#allocation2] sm:$0x8] %vm81_vm4, %v313_v56  ;;  %v354_v59 = vpop.permute.xlu0 %353  ;;  %v375_v60 = vpop.permute.xlu1 %374 }
  0x94   :  { %356 = vst.msk [vmem:[#allocation2 + $0x4] sm:$0x2] %vm36_vm2, %v354_v59  ;;  %514 = vmatpush3.bf16.msra.mxu0 %v205_v61 }
  0x95   :  { %377 = vst.msk [vmem:[#allocation2 + $0x4] sm:$0x4] %vm58_vm3, %v375_v60 }
  0x97   :  { %v397_v63 = vpop.permute.xlu0 %396  ;;  %v417_v0 = vpop.permute.xlu1 %416  ;;  %516 = vmatmul.mubr.msk.bf16.vlgmr.msra.gmra.mrb[0].mxu0 %vm199_vm6, %v12_v62 }
  0x98   :  { %399 = vst.msk [vmem:[#allocation2 + $0x4] sm:$0x8] %vm81_vm4, %v397_v63 }
  0x99   :  { %419 = vst.msk [vmem:[#allocation2 + $0x8] sm:$0x1] %vm14_vm0, %v417_v0 }
  0x9f   :  { %v547_v1 = vld [vmem:[#allocation2] sm:$0xff]  }
  0xa0   :  { %v548_v2 = vld [vmem:[#allocation2 + $0x8] ss:$0 sps:$4 sm:$0x11]   ;;  %520 = vmatpush3.bf16.msra.mxu1 %v547_v1 }
  0xa1   :  { %521 = vmatprep.subr.bf16.mxu1 %v557_v31  ;;  %v433_v3 = vsel %vm203_vm5, %v548_v2, 0 }
  0xa4   :  { %522 = vmatpush3.bf16.msra.mxu1 %v433_v3 }
  0xa7   :  { %524 = vmatmul.mubr.msk.bf16.vlgmr.msra.gmra.mrb[0].mxu1 %vm199_vm6, %v12_v62 }
 0x16a   :  { %v241_v4 = vpop.f32.mrb[0].mxu0 }
 0x16b   :  { %248 = vst.msk [vmem:[%s659_s2] sm:$0x3] %vm247_vm7, %v241_v4  ;;  %v517_v5 = vpop.f32.mrb[1].mxu0 }
 0x16c   :  { %v244_v6 = vpop.f32.mrb[2].mxu0 }
 0x16d   :  { %v518_v7 = vpop.f32.mrb[3].mxu0 }
 0x17a   :  { %v469_v8 = vpop.f32.mrb[0].mxu1 }
 0x17b   :  { %504 = vst.msk [vmem:[%s659_s2 + $0x2] sm:$0x3] %vm247_vm7, %v469_v8  ;;  %v525_v9 = vpop.f32.mrb[1].mxu1 }
 0x17c   :  { %v472_v10 = vpop.f32.mrb[2].mxu1 }
 0x17d   :  { %v526_v11 = vpop.f32.mrb[3].mxu1 }

// kernel: a_call__.3
= control target key start
LH: loop header
LB: loop body
LE: loop exit
PB: predicated region body
PF: predicated region fallthrough
CT: control target
= control target key end

     0   :  { %v33_v0 = vlaneseq  ;;  %v1056_v1 = vmov 1935823168   ;;  %vm40_vm0 = vcmask 253952   ;;  %s1057_s15 = smov 109   ;;  %s1058_s16 = smov 127   ;;  %v1063_v34 = vmov 0.0   ;;  %s1280_s0 = inlined_call_operand.vmem [shape: bf16[2,2,342], index: 0, kind: input, shape index: {}]   ;;  %s1281_s1 = inlined_call_operand.vmem [shape: bf16[2,18], index: 1, kind: input, shape index: {}]   ;;  %s1282_s2 = inlined_call_operand.vmem [shape: f32[2,2,288], index: 2, kind: output, shape index: {}]  }
   0x1   :  { %v31_v2 = vunpack.c.l.s4 %v1056_v1  ;;  %v967_v3 = vld.sshfl [vmem:[%s1280_s0] sm:$0x15 pattern:$0x73625140]  ;;  %s1059_s17 = smov 126   ;;  %s1060_s20 = smov 110   ;;  %1010 = vmatprep.subr.bf16.mxu1 %v1063_v34 }
   0x2   :  { %v1087_v4 = vshrl.u32 %v33_v0, 7  ;;  %965 = vst.sshfl [vmem:[#allocation2] sm:$0x5 pattern:$0x75316420] %v967_v3  ;;  %v168_v6 = vcombine.high %v967_v3, %v967_v3  ;;  %v51_v7 = vcombine.low %v967_v3, %v967_v3  ;;  %s1061_s23 = smov 108  }
   0x3   :  { %v32_v5 = vunpack.c.0.s8 %v31_v2  ;;  %v1039_v8 = vld [vmem:[%s1280_s0] ss:$0 sps:$4 sm:$0x77]   ;;  %s1062_s24 = smov 92   ;;  %s1064_s29 = smov 91   ;;  %vm1066_vm1 = vmmov 0  }
   0x4   :  { %v1040_v10 = vld [vmem:[%s1280_s0] ss:$0 sps:$4 sm:$0x77]   ;;  %v1043_v32 = vld [vmem:[%s1280_s0 + $0x3] ss:$0 sps:$4 sm:$0x77]   ;;  %1014 = vmatprep.mubr.msk.bf16.mxu1 %vm1066_vm1, %v1063_v34 }
   0x5   :  { %v1093_v9 = vsub.s32 %v32_v5, %v1087_v4  ;;  %v1041_v20 = vld [vmem:[%s1280_s0] ss:$0 sps:$4 sm:$0x77]   ;;  %v1044_v37 = vld [vmem:[%s1280_s0 + $0x3] ss:$0 sps:$4 sm:$0x77]  }
   0x6   :  { %v1042_v24 = vld [vmem:[%s1280_s0] ss:$0 sps:$4 sm:$0x77]   ;;  %s1065_s4 = smov 90   ;;  %v1067_v59 = vmov 0   ;;  %vm79_vm2 = vcmask 254977  }
   0x7   :  { %v182_v11 = vrot.slane %v168_v6, %v1093_v9  ;;  %v58_v12 = vrot.slane %v51_v7, %v1093_v9  ;;  %v90_v13 = vrot.slane %v1039_v8, %v1093_v9  ;;  %v65_v15 = vrot.slane %v967_v3, %v1093_v9  ;;  %v1138_v33 = vld.sshfl [vmem:[%s1280_s0 + $0x3] sm:$0x15 pattern:$0x73625140]  ;;  %422 = vmatprep.mubr.bf16.mxu0 %v1067_v59 }
   0x8   :  { %v129_v16 = vrot.slane %v1040_v10, %v1093_v9  ;;  %v242_v23 = vrot.slane %v1041_v20, %v1093_v9  ;;  %v280_v26 = vrot.slane %v1042_v24, %v1093_v9  ;;  %v535_v35 = vcombine.low %v1138_v33, %v1138_v33  ;;  %v1045_v48 = vld [vmem:[%s1280_s0 + $0x3] ss:$0 sps:$4 sm:$0x77]  }
   0x9   :  { %185 = vrot.lane.b32.xlu1 %v182_v11, %s1057_s15  ;;  %66 = vrot.lane.b32.xlu0 %v58_v12, %s1058_s16  ;;  %v98_v14 = vrot.slane %v90_v13, %v1093_v9  ;;  %41 = vst.msk [vmem:[#allocation2 + $0x8] sm:$0x1] %vm40_vm0, %v182_v11  ;;  %v91_v18 = vcombine.high %v90_v13, %v90_v13  ;;  %v1046_v51 = vld [vmem:[%s1280_s0 + $0x3] ss:$0 sps:$4 sm:$0x77]   ;;  %vm72_vm3 = vcmask 1043456  }
   0xa   :  { %v144_v17 = vrot.slane %v129_v16, %v1093_v9  ;;  %v130_v19 = vcombine.low %v129_v16, %v129_v16  ;;  %v243_v25 = vcombine.high %v242_v23, %v242_v23  ;;  %v250_v28 = vrot.slane %v242_v23, %v1093_v9 }
   0xb   :  { %v105_v21 = vrot.slane %v91_v18, %v1093_v9  ;;  %v281_v29 = vcombine.low %v280_v26, %v280_v26  ;;  %v295_v30 = vrot.slane %v280_v26, %v1093_v9  ;;  %v571_v36 = vrot.slane %v1043_v32, %v1093_v9 }
   0xc   :  { %v137_v22 = vrot.slane %v130_v19, %v1093_v9  ;;  %v257_v27 = vrot.slane %v243_v25, %v1093_v9  ;;  %v549_v38 = vrot.slane %v1138_v33, %v1093_v9  ;;  %v542_v39 = vrot.slane %v535_v35, %v1093_v9 }
   0xd   :  { %106 = vrot.lane.b32.xlu1 %v98_v14, %s1059_s17  ;;  %68 = vrot.lane.b32.xlu0 %v65_v15, %s1058_s16  ;;  %v288_v31 = vrot.slane %v281_v29, %v1093_v9  ;;  %v572_v40 = vcombine.high %v571_v36, %v571_v36  ;;  %v608_v41 = vrot.slane %v1044_v37, %v1093_v9  ;;  %vm74_vm4 = vcmask 1039360  }
   0xe   :  { %v579_v43 = vrot.slane %v571_v36, %v1093_v9  ;;  %v645_v47 = vcombine.high %v1138_v33, %v1138_v33  ;;  %v717_v50 = vrot.slane %v1045_v48, %v1093_v9  ;;  %v754_v53 = vrot.slane %v1046_v51, %v1093_v9 }
   0xf   :  { %v586_v42 = vrot.slane %v572_v40, %v1093_v9  ;;  %v609_v44 = vcombine.low %v608_v41, %v608_v41  ;;  %v623_v45 = vrot.slane %v608_v41, %v1093_v9  ;;  %vm157_vm5 = vcmask 257027  }
  0x10   :  { %v1171_v49 = vrot.slane %v645_v47, %v1093_v9  ;;  %v718_v52 = vcombine.high %v717_v50, %v717_v50  ;;  %v725_v55 = vrot.slane %v717_v50, %v1093_v9  ;;  %v755_v56 = vcombine.low %v754_v53, %v754_v53 }
  0x11   :  { %147 = vrot.lane.b32.xlu1 %v144_v17, %s1060_s20  ;;  %183 = vrot.lane.b32.xlu0 %v65_v15, %s1057_s15  ;;  %v616_v46 = vrot.slane %v609_v44, %v1093_v9  ;;  %v769_v57 = vrot.slane %v754_v53, %v1093_v9  ;;  %vm190_vm6 = vcmask 891904   ;;  %vm118_vm7 = vcmask 256002  }
  0x12   :  { %v732_v54 = vrot.slane %v718_v52, %v1093_v9  ;;  %v762_v58 = vrot.slane %v755_v56, %v1093_v9  ;;  %vm152_vm8 = vcmask 900096   ;;  %vm113_vm9 = vcmask 1031168  }
  0x13   :  { %vm227_vm10 = vcmask 883712   ;;  %vm265_vm11 = vcmask 752640   ;;  %vm303_vm12 = vcmask 744448   ;;  %vm340_vm13 = vcmask 736256  }
  0x14   :  { %vm380_vm14 = vcmask 1040384   ;;  %vm376_vm15 = vcmask 146432  }
  0x15   :  { %108 = vrot.lane.b32.xlu1 %v105_v21, %s1059_s17  ;;  %145 = vrot.lane.b32.xlu0 %v137_v22, %s1060_s20 }
  0x19   :  { %222 = vrot.lane.b32.xlu1 %v65_v15, %s1061_s23  ;;  %220 = vrot.lane.b32.xlu0 %v58_v12, %s1061_s23 }
  0x1d   :  { %260 = vrot.lane.b32.xlu1 %v257_v27, %s1062_s24  ;;  %258 = vrot.lane.b32.xlu0 %v250_v28, %s1062_s24 }
  0x21   :  { %298 = vrot.lane.b32.xlu1 %v295_v30, %s1064_s29  ;;  %296 = vrot.lane.b32.xlu0 %v288_v31, %s1064_s29 }
  0x25   :  { %335 = vrot.lane.b32.xlu1 %v182_v11, %s1065_s4  ;;  %333 = vrot.lane.b32.xlu0 %v65_v15, %s1065_s4 }
  0x29   :  { %552 = vrot.lane.b32.xlu1 %v549_v38, %s1058_s16  ;;  %550 = vrot.lane.b32.xlu0 %v542_v39, %s1058_s16 }
  0x2d   :  { %589 = vrot.lane.b32.xlu1 %v586_v42, %s1059_s17  ;;  %587 = vrot.lane.b32.xlu0 %v579_v43, %s1059_s17 }
  0x31   :  { %626 = vrot.lane.b32.xlu1 %v623_v45, %s1060_s20  ;;  %624 = vrot.lane.b32.xlu0 %v616_v46, %s1060_s20 }
  0x35   :  { %662 = vrot.lane.b32.xlu1 %v1171_v49, %s1057_s15  ;;  %660 = vrot.lane.b32.xlu0 %v549_v38, %s1057_s15 }
  0x39   :  { %698 = vrot.lane.b32.xlu1 %v549_v38, %s1061_s23  ;;  %696 = vrot.lane.b32.xlu0 %v542_v39, %s1061_s23 }
  0x3d   :  { %735 = vrot.lane.b32.xlu1 %v732_v54, %s1062_s24  ;;  %733 = vrot.lane.b32.xlu0 %v725_v55, %s1062_s24 }
  0x41   :  { %772 = vrot.lane.b32.xlu1 %v769_v57, %s1064_s29  ;;  %770 = vrot.lane.b32.xlu0 %v762_v58, %s1064_s29 }
  0x45   :  { %808 = vrot.lane.b32.xlu1 %v1171_v49, %s1065_s4  ;;  %806 = vrot.lane.b32.xlu0 %v549_v38, %s1065_s4 }
  0x7b   :  { %v186_v60 = vpop.permute.xlu1 %185  ;;  %v67_v61 = vpop.permute.xlu0 %66 }
  0x7c   :  { %195 = vst.msk [vmem:[#allocation2 + $0x14] sm:$0x1] %vm40_vm0, %v186_v60  ;;  %v70_v0 = vrot.slane %v67_v61, 4  ;;  %v188_v7 = vrot.slane %v186_v60, 4 }
  0x7f   :  { %v107_v62 = vpop.permute.xlu1 %106  ;;  %v69_v63 = vpop.permute.xlu0 %68 }
  0x80   :  { %v71_v1 = vrot.slane %v69_v63, 4  ;;  %80 = vst.msk [vmem:[#allocation2 + $0x8] sm:$0x2] %vm79_vm2, %v69_v63  ;;  %v110_v13 = vrot.slane %v107_v62, 4 }
  0x82   :  { %v73_v2 = vsel %vm72_vm3, %v70_v0, %v71_v1 }
  0x83   :  { %v148_v3 = vpop.permute.xlu1 %147  ;;  %v184_v5 = vpop.permute.xlu0 %183  ;;  %v75_v6 = vsel %vm74_vm4, %v67_v61, %v73_v2 }
  0x84   :  { %158 = vst.msk [vmem:[#allocation2 + $0x8] sm:$0x8] %vm157_vm5, %v148_v3  ;;  %v187_v8 = vrot.slane %v184_v5, 4  ;;  %78 = vst [vmem:[#allocation2] sm:$0x22] %v75_v6  ;;  %v150_v14 = vrot.slane %v148_v3, 4 }
  0x85   :  { %v1234_v3 = vld [vmem:[%s1281_s1] sm:$0x1] }
  0x86   :  { %v189_v9 = vsel %vm72_vm3, %v187_v8, %v188_v7 }
  0x87   :  { %v191_v10 = vsel %vm190_vm6, %v184_v5, %v189_v9  ;;  %v109_v11 = vpop.permute.xlu1 %108  ;;  %v146_v12 = vpop.permute.xlu0 %145 }
  0x88   :  { %194 = vst [vmem:[#allocation2 + $0xc] sm:$0x11] %v191_v10  ;;  %v111_v15 = vrot.slane %v109_v11, 4  ;;  %119 = vst.msk [vmem:[#allocation2 + $0x8] sm:$0x4] %vm118_vm7, %v109_v11  ;;  %v149_v16 = vrot.slane %v146_v12, 4 }
  0x8a   :  { %v112_v17 = vsel %vm72_vm3, %v110_v13, %v111_v15  ;;  %v151_v18 = vsel %vm72_vm3, %v149_v16, %v150_v14 }
  0x8b   :  { %v153_v19 = vsel %vm152_vm8, %v146_v12, %v151_v18  ;;  %v223_v20 = vpop.permute.xlu1 %222  ;;  %v221_v21 = vpop.permute.xlu0 %220  ;;  %v114_v22 = vsel %vm113_vm9, %v107_v62, %v112_v17 }
  0x8c   :  { %156 = vst [vmem:[#allocation2] sm:$0x88] %v153_v19  ;;  %v225_v23 = vrot.slane %v223_v20, 4  ;;  %232 = vst.msk [vmem:[#allocation2 + $0x14] sm:$0x2] %vm79_vm2, %v223_v20  ;;  %v224_v24 = vrot.slane %v221_v21, 4 }
  0x8d   :  { %117 = vst [vmem:[#allocation2] sm:$0x44] %v114_v22 }
  0x8e   :  { %v226_v25 = vsel %vm72_vm3, %v224_v24, %v225_v23 }
  0x8f   :  { %v228_v26 = vsel %vm227_vm10, %v221_v21, %v226_v25  ;;  %v261_v27 = vpop.permute.xlu1 %260  ;;  %v259_v28 = vpop.permute.xlu0 %258  ;;  %v347_v29 = vld [vmem:[#allocation2 + $0x8] sm:$0xf] }
  0x90   :  { %231 = vst [vmem:[#allocation2 + $0xc] sm:$0x22] %v228_v26  ;;  %v263_v30 = vrot.slane %v261_v27, 4  ;;  %270 = vst.msk [vmem:[#allocation2 + $0x14] sm:$0x4] %vm118_vm7, %v261_v27  ;;  %v262_v31 = vrot.slane %v259_v28, 4 }
  0x91   :  { %525 = vst.msk [vmem:[#allocation2 + $0x8] sm:$0x1] %vm40_vm0, %v1171_v49 }
  0x92   :  { %v264_v32 = vsel %vm72_vm3, %v262_v31, %v263_v30 }
  0x93   :  { %v266_v35 = vsel %vm265_vm11, %v259_v28, %v264_v32  ;;  %v299_v36 = vpop.permute.xlu1 %298  ;;  %v297_v37 = vpop.permute.xlu0 %296 }
  0x94   :  { %v346_v38 = vld [vmem:[#allocation2] sm:$0xff]  ;;  %269 = vst [vmem:[#allocation2 + $0xc] sm:$0x44] %v266_v35  ;;  %v301_v39 = vrot.slane %v299_v36, 4  ;;  %308 = vst.msk [vmem:[#allocation2 + $0x14] sm:$0x8] %vm157_vm5, %v299_v36 }
  0x95   :  { %v300_v40 = vrot.slane %v297_v37, 4  ;;  %981 = vst.sshfl [vmem:[#allocation2] sm:$0x5 pattern:$0x75316420] %v1138_v33 }
  0x97   :  { %v302_v41 = vsel %vm72_vm3, %v300_v40, %v301_v39  ;;  %v336_v43 = vpop.permute.xlu1 %335  ;;  %v334_v44 = vpop.permute.xlu0 %333 }
  0x98   :  { %v304_v42 = vsel %vm303_vm12, %v297_v37, %v302_v41  ;;  %v338_v45 = vrot.slane %v336_v43, 4  ;;  %345 = vst.msk [vmem:[#allocation2 + $0x20] sm:$0x1] %vm40_vm0, %v336_v43  ;;  %v337_v46 = vrot.slane %v334_v44, 4 }
  0x99   :  { %307 = vst [vmem:[#allocation2 + $0xc] sm:$0x88] %v304_v42 }
  0x9a   :  { %v339_v47 = vsel %vm72_vm3, %v337_v46, %v338_v45 }
  0x9b   :  { %v341_v48 = vsel %vm340_vm13, %v334_v44, %v339_v47  ;;  %v553_v49 = vpop.permute.xlu1 %552  ;;  %v551_v50 = vpop.permute.xlu0 %550  ;;  %v349_v51 = vld [vmem:[#allocation2 + $0x14] sm:$0xf] }
  0x9c   :  { %344 = vst [vmem:[#allocation2 + $0x18] sm:$0x11] %v341_v48  ;;  %v555_v33 = vrot.slane %v553_v49, 4  ;;  %561 = vst.msk [vmem:[#allocation2 + $0x8] sm:$0x2] %vm79_vm2, %v553_v49  ;;  %v554_v52 = vrot.slane %v551_v50, 4  ;;  %v972_v53 = vcombine.low %v347_v29, %v349_v51 }
  0x9e   :  { %v556_v54 = vsel %vm72_vm3, %v554_v52, %v555_v33  ;;  %1011 = vmatpush3.bf16.msra.mxu1 %v972_v53 }
  0x9f   :  { %v557_v55 = vsel %vm74_vm4, %v551_v50, %v556_v54  ;;  %v590_v56 = vpop.permute.xlu1 %589  ;;  %v588_v57 = vpop.permute.xlu0 %587  ;;  %1012 = vmatprep.subr.bf16.mxu1 %v1063_v34  ;;  %v1047_v60 = vld [vmem:[#allocation2 + $0x20] ss:$0 sps:$4 sm:$0x11]  }
  0xa0   :  { %v348_v58 = vld [vmem:[#allocation2 + $0xc] sm:$0xff]  ;;  %560 = vst [vmem:[#allocation2] sm:$0x22] %v557_v55  ;;  %v592_v61 = vrot.slane %v590_v56, 4  ;;  %598 = vst.msk [vmem:[#allocation2 + $0x8] sm:$0x4] %vm118_vm7, %v590_v56 }
  0xa1   :  { %v591_v62 = vrot.slane %v588_v57, 4  ;;  %v971_v63 = vcombine.high %v346_v38, %v348_v58  ;;  %v970_v0 = vcombine.low %v346_v38, %v348_v58  ;;  %v388_v1 = vsel %vm380_vm14, %v1047_v60, 0 }
  0xa2   :  { %1013 = vmatpush3.bf16.msra.mxu1 %v388_v1 }
  0xa3   :  { %v593_v2 = vsel %vm72_vm3, %v591_v62, %v592_v61  ;;  %390 = vmatprep.subr.bf16.mxu0 %v971_v63  ;;  %v627_v6 = vpop.permute.xlu1 %626  ;;  %v625_v7 = vpop.permute.xlu0 %624  ;;  %v350_v8 = vld [vmem:[#allocation2 + $0x18] sm:$0x11]  ;;  %1018 = vmatprep.subr.bf16.mxu1 %v1063_v34 }
  0xa4   :  { %v594_v5 = vsel %vm113_vm9, %v588_v57, %v593_v2  ;;  %391 = vmatpush1.bf16.msra.mxu0 %v970_v0  ;;  %v629_v9 = vrot.slane %v627_v6, 4  ;;  %635 = vst.msk [vmem:[#allocation2 + $0x8] sm:$0x8] %vm157_vm5, %v627_v6  ;;  %v628_v10 = vrot.slane %v625_v7, 4  ;;  %v974_v11 = vcombine.high %v350_v8, %v350_v8 }
  0xa5   :  { %597 = vst [vmem:[#allocation2] sm:$0x44] %v594_v5  ;;  %v973_v12 = vcombine.low %v350_v8, %v350_v8  ;;  %1015 = vmatmul.mubr.msk.bf16.vlgmr.msra.gmra.mrb[0].mxu1 %vm376_vm15, %v1234_v3 }
  0xa6   :  { %v630_v13 = vsel %vm72_vm3, %v628_v10, %v629_v9  ;;  %976 = vmatprep.subr.msk.bf16.mxu0 %vm380_vm14, %v974_v11  ;;  %1022 = vmatprep.mubr.msk.bf16.mxu1 %vm1066_vm1, %v1063_v34  ;;  %vm492_vm1 = vcmask 1043458  }
  0xa7   :  { %v382_v14 = vsel %vm380_vm14, %v973_v12, 0  ;;  %v631_v15 = vsel %vm152_vm8, %v625_v7, %v630_v13  ;;  %v663_v16 = vpop.permute.xlu1 %662  ;;  %v661_v17 = vpop.permute.xlu0 %660 }
  0xa8   :  { %393 = vmatpush1.bf16.msra.mxu0 %v382_v14  ;;  %634 = vst [vmem:[#allocation2] sm:$0x88] %v631_v15  ;;  %v665_v18 = vrot.slane %v663_v16, 4  ;;  %671 = vst.msk [vmem:[#allocation2 + $0x14] sm:$0x1] %vm40_vm0, %v663_v16  ;;  %v664_v19 = vrot.slane %v661_v17, 4 }
  0xaa   :  { %v666_v20 = vsel %vm72_vm3, %v664_v19, %v665_v18 }
  0xab   :  { %977 = vmatmul.mubr.msk.bf16.vlgmr.msra.gmra.mrb[0].mxu0 %vm376_vm15, %v1234_v3  ;;  %v667_v21 = vsel %vm190_vm6, %v661_v17, %v666_v20  ;;  %v699_v22 = vpop.permute.xlu1 %698  ;;  %v697_v23 = vpop.permute.xlu0 %696 }
  0xac   :  { %889 = vmatprep.mubr.bf16.mxu0 %v1067_v59  ;;  %670 = vst [vmem:[#allocation2 + $0xc] sm:$0x11] %v667_v21  ;;  %v701_v24 = vrot.slane %v699_v22, 4  ;;  %707 = vst.msk [vmem:[#allocation2 + $0x14] sm:$0x2] %vm79_vm2, %v699_v22  ;;  %v700_v25 = vrot.slane %v697_v23, 4 }
  0xae   :  { %v702_v26 = vsel %vm72_vm3, %v700_v25, %v701_v24 }
  0xaf   :  { %v703_v27 = vsel %vm227_vm10, %v697_v23, %v702_v26  ;;  %v736_v28 = vpop.permute.xlu1 %735  ;;  %v734_v29 = vpop.permute.xlu0 %733 }
  0xb0   :  { %706 = vst [vmem:[#allocation2 + $0xc] sm:$0x22] %v703_v27  ;;  %v738_v30 = vrot.slane %v736_v28, 4  ;;  %744 = vst.msk [vmem:[#allocation2 + $0x14] sm:$0x4] %vm118_vm7, %v736_v28  ;;  %v737_v31 = vrot.slane %v734_v29, 4 }
  0xb2   :  { %v739_v32 = vsel %vm72_vm3, %v737_v31, %v738_v30 }
  0xb3   :  { %v740_v59 = vsel %vm265_vm11, %v734_v29, %v739_v32  ;;  %v773_v35 = vpop.permute.xlu1 %772  ;;  %v771_v36 = vpop.permute.xlu0 %770 }
  0xb4   :  { %743 = vst [vmem:[#allocation2 + $0xc] sm:$0x44] %v740_v59  ;;  %v775_v37 = vrot.slane %v773_v35, 4  ;;  %781 = vst.msk [vmem:[#allocation2 + $0x14] sm:$0x8] %vm157_vm5, %v773_v35  ;;  %v774_v38 = vrot.slane %v771_v36, 4 }
  0xb6   :  { %v776_v39 = vsel %vm72_vm3, %v774_v38, %v775_v37 }
  0xb7   :  { %v777_v40 = vsel %vm303_vm12, %v771_v36, %v776_v39  ;;  %v809_v41 = vpop.permute.xlu1 %808  ;;  %v807_v42 = vpop.permute.xlu0 %806 }
  0xb8   :  { %780 = vst [vmem:[#allocation2 + $0xc] sm:$0x88] %v777_v40  ;;  %v811_v43 = vrot.slane %v809_v41, 4  ;;  %817 = vst.msk [vmem:[#allocation2 + $0x20] sm:$0x1] %vm40_vm0, %v809_v41  ;;  %v810_v44 = vrot.slane %v807_v42, 4 }
  0xb9   :  { %vm491_vm0 = vcmask 1041408  }
  0xba   :  { %v812_v45 = vsel %vm72_vm3, %v810_v44, %v811_v43  ;;  %vm493_vm2 = vmor %vm492_vm1, %vm491_vm0  ;;  %vm494_vm3 = vcmask 259076  }
  0xbb   :  { %v813_v46 = vsel %vm340_vm13, %v807_v42, %v812_v45  ;;  %v1049_v47 = vld [vmem:[#allocation2 + $0x8] ss:$12 sps:$4 sm:$0xff]   ;;  %vm495_vm4 = vmor %vm494_vm3, %vm493_vm2 }
  0xbc   :  { %816 = vst [vmem:[#allocation2 + $0x18] sm:$0x11] %v813_v46  ;;  %1019 = vmatpush3.bf16.msra.mxu1 %v1049_v47 }
  0xbd   :  { %1020 = vmatprep.subr.bf16.mxu1 %v1063_v34  ;;  %v1068_v34 = vmov 1983009808  }
  0xbe   :  { %v476_v55 = vunpack.c.l.s4 %v1068_v34 }
  0xbf   :  { %v1050_v48 = vld [vmem:[#allocation2] ss:$12 sps:$4 sm:$0xff]   ;;  %v1052_v49 = vld [vmem:[#allocation2 + $0x4] ss:$12 sps:$4 sm:$0xff]  }
  0xc0   :  { %v1053_v50 = vld [vmem:[#allocation2 + $0x20] ss:$0 sps:$4 sm:$0x11]   ;;  %857 = vmatprep.subr.bf16.mxu0 %v1052_v49  ;;  %v477_v56 = vunpack.c.0.s8 %v476_v55 }
  0xc1   :  { %858 = vmatpush1.bf16.msra.mxu0 %v1050_v48  ;;  %v855_v51 = vsel %vm380_vm14, %v1053_v50, 0 }
  0xc2   :  { %1021 = vmatpush3.bf16.msra.mxu1 %v855_v51  ;;  %v480_v61 = vsub.s32 %v477_v56, %v1087_v4 }
  0xc3   :  { %v822_v33 = vld [vmem:[#allocation2 + $0x18] sm:$0x11] }
  0xc4   :  { %v998_v52 = vcombine.high %v822_v33, %v822_v33  ;;  %v997_v53 = vcombine.low %v822_v33, %v822_v33 }
  0xc5   :  { %1023 = vmatmul.mubr.msk.bf16.vlgmr.msra.gmra.mrb[4].mxu1 %vm376_vm15, %v1234_v3 }
  0xc6   :  { %1000 = vmatprep.subr.msk.bf16.mxu0 %vm380_vm14, %v998_v52  ;;  %v849_v54 = vsel %vm380_vm14, %v997_v53, 0 }
  0xc7   :  { %860 = vmatpush1.bf16.msra.mxu0 %v849_v54 }
  0xca   :  { %1001 = vmatmul.mubr.msk.bf16.vlgmr.msra.gmra.mrb[4].mxu0 %vm376_vm15, %v1234_v3 }
 0x178   :  { %v465_v57 = vpop.f32.mrb[0].mxu1 }
 0x179   :  { %v1016_v58 = vpop.f32.mrb[1].mxu1  ;;  %v488_v5 = vrot.slane %v465_v57, %v480_v61 }
 0x17a   :  { %v468_v60 = vpop.f32.mrb[2].mxu1 }
 0x17b   :  { %v1017_v62 = vpop.f32.mrb[3].mxu1 }
 0x17e   :  { %v424_v63 = vpop.f32.mrb[0].mxu0 }
 0x17f   :  { %v426_v0 = vpop.f32.mrb[1].mxu0 }
 0x180   :  { %v474_v1 = vcombine.low %v424_v63, %v426_v0  ;;  %v428_v2 = vpop.f32.mrb[2].mxu0 }
 0x181   :  { %v429_v6 = vpop.f32.mrb[3].mxu0 }
 0x182   :  { %v481_v3 = vrot.slane %v474_v1, %v480_v61 }
 0x184   :  { %v489_v7 = vcombine.low %v481_v3, %v488_v5 }
 0x186   :  { %496 = vst.msk [vmem:[%s1282_s2] sm:$0x3f] %vm495_vm4, %v489_v7 }
 0x198   :  { %v932_v8 = vpop.f32.mrb[4].mxu1 }
 0x199   :  { %v1024_v4 = vpop.f32.mrb[5].mxu1  ;;  %v955_v14 = vrot.slane %v932_v8, %v480_v61 }
 0x19a   :  { %v935_v9 = vpop.f32.mrb[6].mxu1 }
 0x19b   :  { %v1025_v10 = vpop.f32.mrb[7].mxu1 }
 0x19d   :  { %v891_v11 = vpop.f32.mrb[4].mxu0 }
 0x19e   :  { %v893_v12 = vpop.f32.mrb[5].mxu0 }
 0x19f   :  { %v941_v13 = vcombine.low %v891_v11, %v893_v12  ;;  %v895_v15 = vpop.f32.mrb[6].mxu0 }
 0x1a0   :  { %v896_v16 = vpop.f32.mrb[7].mxu0 }
 0x1a1   :  { %v948_v17 = vrot.slane %v941_v13, %v480_v61 }
 0x1a3   :  { %v956_v18 = vcombine.low %v948_v17, %v955_v14 }
 0x1a5   :  { %1003 = vst.msk [vmem:[%s1282_s2 + $0x6] sm:$0x3f] %vm495_vm4, %v956_v18 }

</bundles_post_ra>
